<compile_context>
chip_gen: v6e
topology: v6e:2x2x1
jax: 0.10.0
libtpu: 0.0.40
codegen_flags: <defaults>
</compile_context>

<pallas_src>
import jax
import jax.numpy as jnp
from jax import lax
from jax.experimental import pallas as pl
from jax.experimental.pallas import tpu as pltpu

_EPS = 1e-5  # nn.BatchNorm3d default eps


def _round_up(v, m):
    return ((v + m - 1) // m) * m


def _vmem_limit_bytes():
    """Generation-aware VMEM limit (~75% of capacity), with a safe fallback."""
    try:
        info = pltpu.get_tpu_info()
        cap = getattr(info, "vmem_capacity_bytes", None)
        if cap:
            return int(cap) * 3 // 4
    except Exception:
        pass
    return 48 * 1024 * 1024


# -----------------------------------------------------------------------------
# Weight packing (wrapper side, done once per call in plain JAX)
# -----------------------------------------------------------------------------
def _pack_conv3_weight(w, width):
    """(3,3,3,Cin,Cout) -> (9*KL, W*Cout) bf16, lowered over (kd,kh).

    Row index = tap(kd,kh)*KL + w_src*Cin + c, col index = w_out*Cout + co.
    The kw tap and the W zero-padding are encoded as a Toeplitz band:
        M[...] = w[kd, kh, w_src - w_out + 1, c, co]  if 0 <= w_src-w_out+1 < 3
    Rows in the lane-pad region [W*Cin, KL) are zero.
    """
    Cin, Cout = w.shape[3], w.shape[4]
    kl = _round_up(width * Cin, 128)
    kw = jnp.arange(width)[None, :] - jnp.arange(width)[:, None] + 1  # [w_out, w_src]
    valid = ((kw >= 0) & (kw <= 2)).astype(w.dtype)
    # sel[kd, kh, w_out, w_src, c, co]
    sel = w[:, :, jnp.clip(kw, 0, 2), :, :] * valid[None, None, :, :, None, None]
    # -> [tap, w_src*Cin + c, w_out*Cout + co]
    sel = jnp.transpose(sel, (0, 1, 3, 4, 2, 5)).reshape(
        9, width * Cin, width * Cout)
    packed = jnp.zeros((9, kl, width * Cout), w.dtype)
    packed = packed.at[:, :width * Cin, :].set(sel)
    return packed.reshape(9 * kl, width * Cout).astype(jnp.bfloat16), kl


def _tile_vec(v, width):
    """Per-channel vector -> packed-lane (1, W*C) f32 vector."""
    return jnp.tile(v, width).reshape(1, -1).astype(jnp.float32)


# -----------------------------------------------------------------------------
# In-kernel conv helper
# -----------------------------------------------------------------------------
def _conv3x3x3(act_f32, xpad_ref, col_ref, w_ref, b_ref):
    """3x3x3 conv (stride 1, pad 1) of a packed activation (D, H, W*Cin).

    Writes the activation (bf16) into the zeroed (D+2, H+2, KL) scratch (D/H
    halo + lane pad), builds the col matrix with 9 full-lane 128-aligned slab
    copies (kw taps / W padding live in the structured weight), and runs one
    bf16 MXU matmul with f32 accumulation.  Returns (D*H, W*Cout) f32 (+bias).
    """
    D, H, WC = act_f32.shape
    Dp, Hp, KL = xpad_ref.shape
    # Zeroed every grid step: the grid axis is "parallel" (per-core scratch,
    # no program_id==0 init possible) and the zero fill is full-lane + tiny.
    xpad_ref[...] = jnp.zeros((Dp, Hp, KL), xpad_ref.dtype)
    xpad_ref[1:D + 1, 1:H + 1, 0:WC] = act_f32.astype(xpad_ref.dtype)
    for kd in range(3):
        for kh in range(3):
            t = kd * 3 + kh
            col_ref[:, t * KL:(t + 1) * KL] = (
                xpad_ref[kd:kd + D, kh:kh + H, :].reshape(D * H, KL))
    y = jnp.dot(col_ref[...], w_ref[...], preferred_element_type=jnp.float32)
    return y + b_ref[...]


# -----------------------------------------------------------------------------
# Stage-1 kernels: BN1+ReLU+conv1 (+ fused downsample) (+ partial BN2 stats)
# -----------------------------------------------------------------------------
def _stage1_kernel(x_ref, s1_ref, t1_ref, w1_ref, b1_ref,
                   h1_ref, csum_ref, cssq_ref, xpad_ref, col_ref):
    D, H, WCo = h1_ref.shape
    # BN1 + ReLU on 64+ dense lanes, f32 on the VPU (dropout p=0.0 == identity)
    a1 = jnp.maximum(x_ref[...] * s1_ref[...] + t1_ref[...], 0.0)
    y = _conv3x3x3(a1, xpad_ref, col_ref, w1_ref, b1_ref)      # (D*H, W*Cout)
    h1 = y.astype(jnp.bfloat16)
    h1_ref[...] = h1.reshape(D, H, WCo)
    # per-example partial BN2 stats, from the bf16-rounded values that stage 2
    # will actually normalize (keeps stats/activation consistent)
    hf = h1.astype(jnp.float32)
    csum_ref[...] = jnp.sum(hf, axis=0, keepdims=True)
    cssq_ref[...] = jnp.sum(hf * hf, axis=0, keepdims=True)


def _stage1_ds_kernel(x_ref, s1_ref, t1_ref, w1_ref, b1_ref,
                      sd_ref, td_ref, wd_ref, bd_ref,
                      h1_ref, id_ref, csum_ref, cssq_ref, xpad_ref, col_ref):
    D, H, WCi = x_ref.shape
    WCo = h1_ref.shape[-1]
    x = x_ref[...]

    # Downsample identity branch: BN_ds (no ReLU) -> 1x1x1 conv done as a
    # lane-packed matmul with a block-diagonal (kron) weight -> stays
    # lane-dense, no repack; x is read from HBM once for both branches.
    xd = (x * sd_ref[...] + td_ref[...]).reshape(D * H, WCi)
    idv = jnp.dot(xd.astype(jnp.bfloat16), wd_ref[...],
                  preferred_element_type=jnp.float32) + bd_ref[...]
    id_ref[...] = idv.reshape(D, H, WCo).astype(id_ref.dtype)   # bf16 to HBM

    # Main branch
    a1 = jnp.maximum(x * s1_ref[...] + t1_ref[...], 0.0)
    y = _conv3x3x3(a1, xpad_ref, col_ref, w1_ref, b1_ref)
    h1 = y.astype(jnp.bfloat16)
    h1_ref[...] = h1.reshape(D, H, WCo)
    hf = h1.astype(jnp.float32)
    csum_ref[...] = jnp.sum(hf, axis=0, keepdims=True)
    cssq_ref[...] = jnp.sum(hf * hf, axis=0, keepdims=True)


# -----------------------------------------------------------------------------
# Stage-2 kernel: BN2 + ReLU + conv2 + residual add
# -----------------------------------------------------------------------------
def _stage2_kernel(h1_ref, s2_ref, t2_ref, w2_ref, b2_ref, res_ref,
                   o_ref, xpad_ref, col_ref):
    D, H, WCo = o_ref.shape
    a2 = jnp.maximum(h1_ref[...].astype(jnp.float32) * s2_ref[...]
                     + t2_ref[...], 0.0)
    y = _conv3x3x3(a2, xpad_ref, col_ref, w2_ref, b2_ref)
    o_ref[...] = (y.reshape(D, H, WCo)
                  + res_ref[...].astype(jnp.float32)).astype(o_ref.dtype)


# -----------------------------------------------------------------------------
# pallas_call wrappers
# -----------------------------------------------------------------------------
def _stage1(x, scale1, shift1, w1, b1, ds=None):
    N, D, H, W, Cin = x.shape
    Cout = w1.shape[-1]
    WCi, WCo = W * Cin, W * Cout

    x_p = x.reshape(N, D, H, WCi)                      # free packed view
    w1p, kl = _pack_conv3_weight(w1, W)
    s1, t1 = _tile_vec(scale1, W), _tile_vec(shift1, W)
    b1t = _tile_vec(b1, W)

    x_spec = pl.BlockSpec((None, D, H, WCi), lambda n: (n, 0, 0, 0))
    yo_spec = pl.BlockSpec((None, D, H, WCo), lambda n: (n, 0, 0, 0))
    vi_spec = pl.BlockSpec((1, WCi), lambda n: (0, 0))
    vo_spec = pl.BlockSpec((1, WCo), lambda n: (0, 0))
    stat_spec = pl.BlockSpec((None, 1, WCo), lambda n: (n, 0, 0))

    in_specs = [x_spec, vi_spec, vi_spec,
                pl.BlockSpec((9 * kl, WCo), lambda n: (0, 0)), vo_spec]
    args = [x_p, s1, t1, w1p, b1t]

    out_shape = [jax.ShapeDtypeStruct((N, D, H, WCo), jnp.bfloat16)]   # h1
    out_specs = [yo_spec]

    if ds is not None:
        sd, td, wd, bd = ds
        wdp = jnp.kron(jnp.eye(W, dtype=wd.dtype), wd).astype(jnp.bfloat16)
        in_specs += [vi_spec, vi_spec,
                     pl.BlockSpec((WCi, WCo), lambda n: (0, 0)), vo_spec]
        args += [_tile_vec(sd, W), _tile_vec(td, W), wdp, _tile_vec(bd, W)]
        out_shape.append(jax.ShapeDtypeStruct((N, D, H, WCo), jnp.bfloat16))
        out_specs.append(yo_spec)
        kernel = _stage1_ds_kernel
    else:
        kernel = _stage1_kernel

    # per-example partial BN2 statistics -> the batch axis stays "parallel"
    out_shape += [jax.ShapeDtypeStruct((N, 1, WCo), jnp.float32),
                  jax.ShapeDtypeStruct((N, 1, WCo), jnp.float32)]
    out_specs += [stat_spec, stat_spec]

    outs = pl.pallas_call(
        kernel,
        grid=(N,),
        in_specs=in_specs,
        out_specs=out_specs,
        out_shape=out_shape,
        scratch_shapes=[pltpu.VMEM((D + 2, H + 2, kl), jnp.bfloat16),
                        pltpu.VMEM((D * H, 9 * kl), jnp.bfloat16)],
        compiler_params=pltpu.CompilerParams(
            dimension_semantics=("parallel",),
            vmem_limit_bytes=_vmem_limit_bytes()),
    )(*args)

    if ds is not None:
        h1, identity, csum, cssq = outs
    else:
        h1, csum, cssq = outs
        identity = None
    return h1, identity, csum, cssq


def _stage2(h1_p, scale2, shift2, w2, b2, identity_p):
    N, D, H, WCo = h1_p.shape
    Cout = w2.shape[-1]
    W = WCo // Cout

    w2p, kl = _pack_conv3_weight(w2, W)
    s2, t2 = _tile_vec(scale2, W), _tile_vec(shift2, W)
    b2t = _tile_vec(b2, W)

    y_spec = pl.BlockSpec((None, D, H, WCo), lambda n: (n, 0, 0, 0))
    v_spec = pl.BlockSpec((1, WCo), lambda n: (0, 0))

    return pl.pallas_call(
        _stage2_kernel,
        grid=(N,),
        in_specs=[y_spec, v_spec, v_spec,
                  pl.BlockSpec((9 * kl, WCo), lambda n: (0, 0)), v_spec,
                  y_spec],
        out_specs=y_spec,
        out_shape=jax.ShapeDtypeStruct((N, D, H, WCo), jnp.float32),
        scratch_shapes=[pltpu.VMEM((D + 2, H + 2, kl), jnp.bfloat16),
                        pltpu.VMEM((D * H, 9 * kl), jnp.bfloat16)],
        compiler_params=pltpu.CompilerParams(
            dimension_semantics=("parallel",),
            vmem_limit_bytes=_vmem_limit_bytes()),
    )(h1_p, s2, t2, w2p, b2t, identity_p.astype(jnp.bfloat16))


# -----------------------------------------------------------------------------
# Module forward (glue in plain JAX: batch stats, param plumbing)
# -----------------------------------------------------------------------------
def preactiv_resblock_bn_forward(x_ndhwc, params):
    """PreactivResBlock_bn forward (training-mode BN, dropout p=0.0 == id)."""
    x = x_ndhwc.astype(jnp.float32)
    N, D, H, W, Cin = x.shape
    Cout = params["w1"].shape[-1]
    count = N * D * H * W

    # Single-pass batch statistics over x. bn1 and the downsample BN see the
    # same input, so they share mean/var.
    xsum = jnp.sum(x, axis=(0, 1, 2, 3))
    xssq = jnp.sum(x * x, axis=(0, 1, 2, 3))
    mean = xsum / count
    var = jnp.maximum(xssq / count - mean * mean, 0.0)   # biased variance
    inv = 1.0 / jnp.sqrt(var + _EPS)

    scale1 = params["bn1_gamma"] * inv
    shift1 = params["bn1_beta"] - mean * scale1

    ds = None
    if params["downsample"]:
        scale_d = params["bn_ds_gamma"] * inv
        shift_d = params["bn_ds_beta"] - mean * scale_d
        ds = (scale_d, shift_d, params["w_ds"], params["b_ds"])

    h1, identity, csum, cssq = _stage1(x, scale1, shift1,
                                       params["w1"], params["b1"], ds)
    if identity is None:
        identity = x.reshape(N, D, H, W * Cin)   # Cin == Cout, stride == 1

    # BN2 statistics from the per-example in-kernel partials (no extra HBM
    # pass over h1): reduce over batch and the packed W lane groups.
    csum_c = csum.reshape(N, W, Cout).sum(axis=(0, 1))
    cssq_c = cssq.reshape(N, W, Cout).sum(axis=(0, 1))
    mean2 = csum_c / count
    var2 = jnp.maximum(cssq_c / count - mean2 * mean2, 0.0)
    scale2 = params["bn2_gamma"] / jnp.sqrt(var2 + _EPS)
    shift2 = params["bn2_beta"] - mean2 * scale2

    out_p = _stage2(h1, scale2, shift2, params["w2"], params["b2"], identity)
    return out_p.reshape(N, D, H, W, Cout)


# -----------------------------------------------------------------------------
# Pure-JAX reference (f32 / HIGHEST precision) for the correctness check
# -----------------------------------------------------------------------------
def _bn_train_ref(x, gamma, beta, eps=_EPS):
    mean = jnp.mean(x, axis=(0, 1, 2, 3), keepdims=True)
    var = jnp.mean(jnp.square(x - mean), axis=(0, 1, 2, 3), keepdims=True)
    return (x - mean) / jnp.sqrt(var + eps) * gamma + beta


def _conv3d_ref(x, w, b, padding):
    dn = ("NDHWC", "DHWIO", "NDHWC")
    y = lax.conv_general_dilated(x, w, window_strides=(1, 1, 1),
                                 padding=padding, dimension_numbers=dn,
                                 precision=lax.Precision.HIGHEST)
    return y + b.reshape(1, 1, 1, 1, -1)


def reference_forward(x, params):
    if params["downsample"]:
        h = _bn_train_ref(x, params["bn_ds_gamma"], params["bn_ds_beta"])
        w_ds = params["w_ds"].reshape(1, 1, 1, *params["w_ds"].shape)
        identity = _conv3d_ref(h, w_ds, params["b_ds"], [(0, 0)] * 3)
    else:
        identity = x
    out = jnp.maximum(
        _bn_train_ref(x, params["bn1_gamma"], params["bn1_beta"]), 0.0)
    out = _conv3d_ref(out, params["w1"], params["b1"], [(1, 1)] * 3)
    out = jnp.maximum(
        _bn_train_ref(out, params["bn2_gamma"], params["bn2_beta"]), 0.0)
    out = _conv3d_ref(out, params["w2"], params["b2"], [(1, 1)] * 3)
    return out + identity


# -----------------------------------------------------------------------------
def _make_params(key, cin, cout, stride=1):
    ks = jax.random.split(key, 11)
    return {
        "downsample": (cin != cout) or (stride != 1),
        "bn1_gamma": 1.0 + 0.1 * jax.random.normal(ks[0], (cin,), jnp.float32),
        "bn1_beta": 0.1 * jax.random.normal(ks[1], (cin,), jnp.float32),
        "w1": 0.1 * jax.random.normal(ks[2], (3, 3, 3, cin, cout), jnp.float32),
        "b1": 0.1 * jax.random.normal(ks[3], (cout,), jnp.float32),
        "bn2_gamma": 1.0 + 0.1 * jax.random.normal(ks[4], (cout,), jnp.float32),
        "bn2_beta": 0.1 * jax.random.normal(ks[5], (cout,), jnp.float32),
        "w2": 0.1 * jax.random.normal(ks[6], (3, 3, 3, cout, cout), jnp.float32),
        "b2": 0.1 * jax.random.normal(ks[7], (cout,), jnp.float32),
        "bn_ds_gamma": 1.0 + 0.1 * jax.random.normal(ks[8], (cin,), jnp.float32),
        "bn_ds_beta": 0.1 * jax.random.normal(ks[9], (cin,), jnp.float32),
        "w_ds": 0.1 * jax.random.normal(ks[10], (cin, cout), jnp.float32),
        "b_ds": jnp.zeros((cout,), jnp.float32),
    }


if __name__ == "__main__":
    key = jax.random.PRNGKey(0)
    N, D, H, W = 2, 8, 8, 8

    for cin, cout in [(4, 8),    # Cin != Cout -> fused downsample branch
                      (8, 8)]:   # Cin == Cout -> plain identity path
        kx, kp, key = jax.random.split(key, 3)
        # PyTorch-convention input: NCDHW; kernels run in (packed) NDHWC
        x_ncdhw = jax.random.normal(kx, (N, cin, D, H, W), jnp.float32)
        x_ndhwc = jnp.transpose(x_ncdhw, (0, 2, 3, 4, 1))
        params = _make_params(kp, cin, cout)

        out_ndhwc = jax.block_until_ready(
            preactiv_resblock_bn_forward(x_ndhwc, params))
        out_ncdhw = jnp.transpose(out_ndhwc, (0, 4, 1, 2, 3))
        assert out_ncdhw.shape == (N, cout, D, H, W)

        ref = reference_forward(x_ndhwc, params)
        max_err = float(jnp.max(jnp.abs(out_ndhwc - ref)))
        if not jnp.allclose(out_ndhwc, ref, rtol=4e-2, atol=4e-2):
            raise AssertionError(
                f"mismatch vs reference (cin={cin}, cout={cout}): "
                f"max abs err = {max_err}")

    print("KERNEL_OK")
</pallas_src>

<mosaic_0001>
module attributes {stable_mosaic.version = 11 : i64} {
  func.func @_stage1_ds_kernel(%arg0: i32, %arg1: memref<1x8x8x32xf32, #tpu.memory_space<vmem>>, %arg2: memref<1x32xf32, #tpu.memory_space<vmem>>, %arg3: memref<1x32xf32, #tpu.memory_space<vmem>>, %arg4: memref<1152x64xbf16, #tpu.memory_space<vmem>>, %arg5: memref<1x64xf32, #tpu.memory_space<vmem>>, %arg6: memref<1x32xf32, #tpu.memory_space<vmem>>, %arg7: memref<1x32xf32, #tpu.memory_space<vmem>>, %arg8: memref<32x64xbf16, #tpu.memory_space<vmem>>, %arg9: memref<1x64xf32, #tpu.memory_space<vmem>>, %arg10: memref<1x8x8x64xbf16, #tpu.memory_space<vmem>>, %arg11: memref<1x8x8x64xbf16, #tpu.memory_space<vmem>>, %arg12: memref<1x1x64xf32, #tpu.memory_space<vmem>>, %arg13: memref<1x1x64xf32, #tpu.memory_space<vmem>>, %arg14: memref<10x10x128xbf16, #tpu.memory_space<vmem>>, %arg15: memref<64x1152xbf16, #tpu.memory_space<vmem>>) attributes {dimension_semantics = [#tpu.dimension_semantics<parallel>], iteration_bounds = array<i64: 2>, scalar_prefetch = 0 : i64, scratch_operands = 2 : i64, tpu.core_type = #tpu.core_type<tc>, window_params = [{transform_indices = @transform_0, window_bounds = array<i64: 1, 8, 8, 32>}, {pipeline_mode = #tpu.pipeline_mode<synchronous>, transform_indices = @transform_1, window_bounds = array<i64: 1, 32>}, {pipeline_mode = #tpu.pipeline_mode<synchronous>, transform_indices = @transform_2, window_bounds = array<i64: 1, 32>}, {pipeline_mode = #tpu.pipeline_mode<synchronous>, transform_indices = @transform_3, window_bounds = array<i64: 1152, 64>}, {pipeline_mode = #tpu.pipeline_mode<synchronous>, transform_indices = @transform_4, window_bounds = array<i64: 1, 64>}, {pipeline_mode = #tpu.pipeline_mode<synchronous>, transform_indices = @transform_5, window_bounds = array<i64: 1, 32>}, {pipeline_mode = #tpu.pipeline_mode<synchronous>, transform_indices = @transform_6, window_bounds = array<i64: 1, 32>}, {pipeline_mode = #tpu.pipeline_mode<synchronous>, transform_indices = @transform_7, window_bounds = array<i64: 32, 64>}, {pipeline_mode = #tpu.pipeline_mode<synchronous>, transform_indices = @transform_8, window_bounds = array<i64: 1, 64>}, {transform_indices = @transform_9, window_bounds = array<i64: 1, 8, 8, 64>}, {transform_indices = @transform_10, window_bounds = array<i64: 1, 8, 8, 64>}, {transform_indices = @transform_11, window_bounds = array<i64: 1, 1, 64>}, {transform_indices = @transform_12, window_bounds = array<i64: 1, 1, 64>}]} {
    %c0 = arith.constant 0 : index
    %c0_0 = arith.constant 0 : index
    %c0_1 = arith.constant 0 : index
    %c0_2 = arith.constant 0 : index
    %0 = vector.load %arg1[%c0, %c0_0, %c0_1, %c0_2] : memref<1x8x8x32xf32, #tpu.memory_space<vmem>>, vector<1x8x8x32xf32>
    %1 = vector.shape_cast %0 : vector<1x8x8x32xf32> to vector<8x8x32xf32>
    %c0_3 = arith.constant 0 : index
    %c0_4 = arith.constant 0 : index
    %2 = vector.load %arg6[%c0_3, %c0_4] : memref<1x32xf32, #tpu.memory_space<vmem>>, vector<1x32xf32>
    %3 = vector.shape_cast %2 : vector<1x32xf32> to vector<1x1x32xf32>
    %4 = vector.broadcast %3 : vector<1x1x32xf32> to vector<8x8x32xf32>
    %5 = arith.mulf %1, %4 : vector<8x8x32xf32>
    %c0_5 = arith.constant 0 : index
    %c0_6 = arith.constant 0 : index
    %6 = vector.load %arg7[%c0_5, %c0_6] : memref<1x32xf32, #tpu.memory_space<vmem>>, vector<1x32xf32>
    %7 = vector.shape_cast %6 : vector<1x32xf32> to vector<1x1x32xf32>
    %8 = vector.broadcast %7 : vector<1x1x32xf32> to vector<8x8x32xf32>
    %9 = arith.addf %5, %8 : vector<8x8x32xf32>
    %10 = vector.shape_cast %9 : vector<8x8x32xf32> to vector<64x32xf32>
    %11 = arith.truncf %10 : vector<64x32xf32> to vector<64x32xbf16>
    %c0_7 = arith.constant 0 : index
    %c0_8 = arith.constant 0 : index
    %12 = vector.load %arg8[%c0_7, %c0_8] : memref<32x64xbf16, #tpu.memory_space<vmem>>, vector<32x64xbf16>
    %cst = arith.constant dense<0.000000e+00> : vector<64x64xf32>
    %13 = tpu.matmul %11, %12, %cst {dimension_numbers = #tpu.dot_dimension_numbers<[1], [0], [0], [1], [0, 0, 1, 1], [], []>} : vector<64x32xbf16>, vector<32x64xbf16>, vector<64x64xf32> -> vector<64x64xf32>
    %c0_9 = arith.constant 0 : index
    %c0_10 = arith.constant 0 : index
    %14 = vector.load %arg9[%c0_9, %c0_10] : memref<1x64xf32, #tpu.memory_space<vmem>>, vector<1x64xf32>
    %15 = vector.broadcast %14 : vector<1x64xf32> to vector<64x64xf32>
    %16 = arith.addf %13, %15 : vector<64x64xf32>
    %17 = vector.shape_cast %16 : vector<64x64xf32> to vector<8x8x64xf32>
    %18 = arith.truncf %17 : vector<8x8x64xf32> to vector<8x8x64xbf16>
    %c0_11 = arith.constant 0 : index
    %c0_12 = arith.constant 0 : index
    %c0_13 = arith.constant 0 : index
    %c0_14 = arith.constant 0 : index
    %19 = vector.load %arg11[%c0_11, %c0_12, %c0_13, %c0_14] : memref<1x8x8x64xbf16, #tpu.memory_space<vmem>>, vector<1x8x8x64xbf16>
    %20 = vector.shape_cast %19 : vector<1x8x8x64xbf16> to vector<8x8x64xbf16>
    %21 = vector.shape_cast %18 : vector<8x8x64xbf16> to vector<1x8x8x64xbf16>
    tpu.vector_store %arg11[%c0_11, %c0_12, %c0_13, %c0_14], %21 {strides = array<i32>} : memref<1x8x8x64xbf16, #tpu.memory_space<vmem>>, vector<1x8x8x64xbf16>,
    %c0_15 = arith.constant 0 : index
    %c0_16 = arith.constant 0 : index
    %22 = vector.load %arg2[%c0_15, %c0_16] : memref<1x32xf32, #tpu.memory_space<vmem>>, vector<1x32xf32>
    %23 = vector.shape_cast %22 : vector<1x32xf32> to vector<1x1x32xf32>
    %24 = vector.broadcast %23 : vector<1x1x32xf32> to vector<8x8x32xf32>
    %25 = arith.mulf %1, %24 : vector<8x8x32xf32>
    %c0_17 = arith.constant 0 : index
    %c0_18 = arith.constant 0 : index
    %26 = vector.load %arg3[%c0_17, %c0_18] : memref<1x32xf32, #tpu.memory_space<vmem>>, vector<1x32xf32>
    %27 = vector.shape_cast %26 : vector<1x32xf32> to vector<1x1x32xf32>
    %28 = vector.broadcast %27 : vector<1x1x32xf32> to vector<8x8x32xf32>
    %29 = arith.addf %25, %28 : vector<8x8x32xf32>
    %cst_19 = arith.constant 0.000000e+00 : f32
    %30 = vector.broadcast %cst_19 : f32 to vector<8x8x32xf32>
    %31 = arith.maximumf %29, %30 : vector<8x8x32xf32>
    %cst_20 = arith.constant 0.000000e+00 : bf16
    %32 = vector.broadcast %cst_20 : bf16 to vector<10x10x128xbf16>
    %c0_21 = arith.constant 0 : index
    %c0_22 = arith.constant 0 : index
    %c0_23 = arith.constant 0 : index
    %33 = vector.load %arg14[%c0_21, %c0_22, %c0_23] : memref<10x10x128xbf16, #tpu.memory_space<vmem>>, vector<10x10x128xbf16>
    tpu.vector_store %arg14[%c0_21, %c0_22, %c0_23], %32 {strides = array<i32>} : memref<10x10x128xbf16, #tpu.memory_space<vmem>>, vector<10x10x128xbf16>,
    %34 = arith.truncf %31 : vector<8x8x32xf32> to vector<8x8x32xbf16>
    %c1 = arith.constant 1 : index
    %c1_24 = arith.constant 1 : index
    %c0_25 = arith.constant 0 : index
    %35 = vector.load %arg14[%c1, %c1_24, %c0_25] : memref<10x10x128xbf16, #tpu.memory_space<vmem>>, vector<8x8x32xbf16>
    tpu.vector_store %arg14[%c1, %c1_24, %c0_25], %34 {strides = array<i32>} : memref<10x10x128xbf16, #tpu.memory_space<vmem>>, vector<8x8x32xbf16>,
    %c0_26 = arith.constant 0 : index
    %c0_27 = arith.constant 0 : index
    %c0_28 = arith.constant 0 : index
    %36 = vector.load %arg14[%c0_26, %c0_27, %c0_28] : memref<10x10x128xbf16, #tpu.memory_space<vmem>>, vector<8x8x128xbf16>
    %37 = vector.shape_cast %36 : vector<8x8x128xbf16> to vector<64x128xbf16>
    %c0_29 = arith.constant 0 : index
    %c0_30 = arith.constant 0 : index
    %38 = vector.load %arg15[%c0_29, %c0_30] : memref<64x1152xbf16, #tpu.memory_space<vmem>>, vector<64x128xbf16>
    tpu.vector_store %arg15[%c0_29, %c0_30], %37 {strides = array<i32>} : memref<64x1152xbf16, #tpu.memory_space<vmem>>, vector<64x128xbf16>,
    %c0_31 = arith.constant 0 : index
    %c1_32 = arith.constant 1 : index
    %c0_33 = arith.constant 0 : index
    %39 = vector.load %arg14[%c0_31, %c1_32, %c0_33] : memref<10x10x128xbf16, #tpu.memory_space<vmem>>, vector<8x8x128xbf16>
    %40 = vector.shape_cast %39 : vector<8x8x128xbf16> to vector<64x128xbf16>
    %c0_34 = arith.constant 0 : index
    %c128 = arith.constant 128 : index
    %41 = vector.load %arg15[%c0_34, %c128] : memref<64x1152xbf16, #tpu.memory_space<vmem>>, vector<64x128xbf16>
    tpu.vector_store %arg15[%c0_34, %c128], %40 {strides = array<i32>} : memref<64x1152xbf16, #tpu.memory_space<vmem>>, vector<64x128xbf16>,
    %c0_35 = arith.constant 0 : index
    %c2 = arith.constant 2 : index
    %c0_36 = arith.constant 0 : index
    %42 = vector.load %arg14[%c0_35, %c2, %c0_36] : memref<10x10x128xbf16, #tpu.memory_space<vmem>>, vector<8x8x128xbf16>
    %43 = vector.shape_cast %42 : vector<8x8x128xbf16> to vector<64x128xbf16>
    %c0_37 = arith.constant 0 : index
    %c256 = arith.constant 256 : index
    %44 = vector.load %arg15[%c0_37, %c256] : memref<64x1152xbf16, #tpu.memory_space<vmem>>, vector<64x128xbf16>
    tpu.vector_store %arg15[%c0_37, %c256], %43 {strides = array<i32>} : memref<64x1152xbf16, #tpu.memory_space<vmem>>, vector<64x128xbf16>,
    %c1_38 = arith.constant 1 : index
    %c0_39 = arith.constant 0 : index
    %c0_40 = arith.constant 0 : index
    %45 = vector.load %arg14[%c1_38, %c0_39, %c0_40] : memref<10x10x128xbf16, #tpu.memory_space<vmem>>, vector<8x8x128xbf16>
    %46 = vector.shape_cast %45 : vector<8x8x128xbf16> to vector<64x128xbf16>
    %c0_41 = arith.constant 0 : index
    %c384 = arith.constant 384 : index
    %47 = vector.load %arg15[%c0_41, %c384] : memref<64x1152xbf16, #tpu.memory_space<vmem>>, vector<64x128xbf16>
    tpu.vector_store %arg15[%c0_41, %c384], %46 {strides = array<i32>} : memref<64x1152xbf16, #tpu.memory_space<vmem>>, vector<64x128xbf16>,
    %c1_42 = arith.constant 1 : index
    %c1_43 = arith.constant 1 : index
    %c0_44 = arith.constant 0 : index
    %48 = vector.load %arg14[%c1_42, %c1_43, %c0_44] : memref<10x10x128xbf16, #tpu.memory_space<vmem>>, vector<8x8x128xbf16>
    %49 = vector.shape_cast %48 : vector<8x8x128xbf16> to vector<64x128xbf16>
    %c0_45 = arith.constant 0 : index
    %c512 = arith.constant 512 : index
    %50 = vector.load %arg15[%c0_45, %c512] : memref<64x1152xbf16, #tpu.memory_space<vmem>>, vector<64x128xbf16>
    tpu.vector_store %arg15[%c0_45, %c512], %49 {strides = array<i32>} : memref<64x1152xbf16, #tpu.memory_space<vmem>>, vector<64x128xbf16>,
    %c1_46 = arith.constant 1 : index
    %c2_47 = arith.constant 2 : index
    %c0_48 = arith.constant 0 : index
    %51 = vector.load %arg14[%c1_46, %c2_47, %c0_48] : memref<10x10x128xbf16, #tpu.memory_space<vmem>>, vector<8x8x128xbf16>
    %52 = vector.shape_cast %51 : vector<8x8x128xbf16> to vector<64x128xbf16>
    %c0_49 = arith.constant 0 : index
    %c640 = arith.constant 640 : index
    %53 = vector.load %arg15[%c0_49, %c640] : memref<64x1152xbf16, #tpu.memory_space<vmem>>, vector<64x128xbf16>
    tpu.vector_store %arg15[%c0_49, %c640], %52 {strides = array<i32>} : memref<64x1152xbf16, #tpu.memory_space<vmem>>, vector<64x128xbf16>,
    %c2_50 = arith.constant 2 : index
    %c0_51 = arith.constant 0 : index
    %c0_52 = arith.constant 0 : index
    %54 = vector.load %arg14[%c2_50, %c0_51, %c0_52] : memref<10x10x128xbf16, #tpu.memory_space<vmem>>, vector<8x8x128xbf16>
    %55 = vector.shape_cast %54 : vector<8x8x128xbf16> to vector<64x128xbf16>
    %c0_53 = arith.constant 0 : index
    %c768 = arith.constant 768 : index
    %56 = vector.load %arg15[%c0_53, %c768] : memref<64x1152xbf16, #tpu.memory_space<vmem>>, vector<64x128xbf16>
    tpu.vector_store %arg15[%c0_53, %c768], %55 {strides = array<i32>} : memref<64x1152xbf16, #tpu.memory_space<vmem>>, vector<64x128xbf16>,
    %c2_54 = arith.constant 2 : index
    %c1_55 = arith.constant 1 : index
    %c0_56 = arith.constant 0 : index
    %57 = vector.load %arg14[%c2_54, %c1_55, %c0_56] : memref<10x10x128xbf16, #tpu.memory_space<vmem>>, vector<8x8x128xbf16>
    %58 = vector.shape_cast %57 : vector<8x8x128xbf16> to vector<64x128xbf16>
    %c0_57 = arith.constant 0 : index
    %c896 = arith.constant 896 : index
    %59 = vector.load %arg15[%c0_57, %c896] : memref<64x1152xbf16, #tpu.memory_space<vmem>>, vector<64x128xbf16>
    tpu.vector_store %arg15[%c0_57, %c896], %58 {strides = array<i32>} : memref<64x1152xbf16, #tpu.memory_space<vmem>>, vector<64x128xbf16>,
    %c2_58 = arith.constant 2 : index
    %c2_59 = arith.constant 2 : index
    %c0_60 = arith.constant 0 : index
    %60 = vector.load %arg14[%c2_58, %c2_59, %c0_60] : memref<10x10x128xbf16, #tpu.memory_space<vmem>>, vector<8x8x128xbf16>
    %61 = vector.shape_cast %60 : vector<8x8x128xbf16> to vector<64x128xbf16>
    %c0_61 = arith.constant 0 : index
    %c1024 = arith.constant 1024 : index
    %62 = vector.load %arg15[%c0_61, %c1024] : memref<64x1152xbf16, #tpu.memory_space<vmem>>, vector<64x128xbf16>
    tpu.vector_store %arg15[%c0_61, %c1024], %61 {strides = array<i32>} : memref<64x1152xbf16, #tpu.memory_space<vmem>>, vector<64x128xbf16>,
    %c0_62 = arith.constant 0 : index
    %c0_63 = arith.constant 0 : index
    %63 = vector.load %arg15[%c0_62, %c0_63] : memref<64x1152xbf16, #tpu.memory_space<vmem>>, vector<64x1152xbf16>
    %c0_64 = arith.constant 0 : index
    %c0_65 = arith.constant 0 : index
    %64 = vector.load %arg4[%c0_64, %c0_65] : memref<1152x64xbf16, #tpu.memory_space<vmem>>, vector<1152x64xbf16>
    %cst_66 = arith.constant dense<0.000000e+00> : vector<64x64xf32>
    %65 = tpu.matmul %63, %64, %cst_66 {dimension_numbers = #tpu.dot_dimension_numbers<[1], [0], [0], [1], [0, 0, 1, 1], [], []>} : vector<64x1152xbf16>, vector<1152x64xbf16>, vector<64x64xf32> -> vector<64x64xf32>
    %c0_67 = arith.constant 0 : index
    %c0_68 = arith.constant 0 : index
    %66 = vector.load %arg5[%c0_67, %c0_68] : memref<1x64xf32, #tpu.memory_space<vmem>>, vector<1x64xf32>
    %67 = vector.broadcast %66 : vector<1x64xf32> to vector<64x64xf32>
    %68 = arith.addf %65, %67 : vector<64x64xf32>
    %69 = arith.truncf %68 : vector<64x64xf32> to vector<64x64xbf16>
    %70 = vector.shape_cast %69 : vector<64x64xbf16> to vector<8x8x64xbf16>
    %c0_69 = arith.constant 0 : index
    %c0_70 = arith.constant 0 : index
    %c0_71 = arith.constant 0 : index
    %c0_72 = arith.constant 0 : index
    %71 = vector.load %arg10[%c0_69, %c0_70, %c0_71, %c0_72] : memref<1x8x8x64xbf16, #tpu.memory_space<vmem>>, vector<1x8x8x64xbf16>
    %72 = vector.shape_cast %71 : vector<1x8x8x64xbf16> to vector<8x8x64xbf16>
    %73 = vector.shape_cast %70 : vector<8x8x64xbf16> to vector<1x8x8x64xbf16>
    tpu.vector_store %arg10[%c0_69, %c0_70, %c0_71, %c0_72], %73 {strides = array<i32>} : memref<1x8x8x64xbf16, #tpu.memory_space<vmem>>, vector<1x8x8x64xbf16>,
    %74 = arith.extf %69 : vector<64x64xbf16> to vector<64x64xf32>
    %cst_73 = arith.constant dense<0.000000e+00> : vector<64xf32>
    %75 = vector.multi_reduction <add>, %74, %cst_73 [0] : vector<64x64xf32> to vector<64xf32>
    %76 = vector.shape_cast %75 : vector<64xf32> to vector<1x64xf32>
    %c0_74 = arith.constant 0 : index
    %c0_75 = arith.constant 0 : index
    %c0_76 = arith.constant 0 : index
    %77 = vector.load %arg12[%c0_74, %c0_75, %c0_76] : memref<1x1x64xf32, #tpu.memory_space<vmem>>, vector<1x1x64xf32>
    %78 = vector.shape_cast %77 : vector<1x1x64xf32> to vector<1x64xf32>
    %79 = vector.shape_cast %76 : vector<1x64xf32> to vector<1x1x64xf32>
    tpu.vector_store %arg12[%c0_74, %c0_75, %c0_76], %79 {strides = array<i32>} : memref<1x1x64xf32, #tpu.memory_space<vmem>>, vector<1x1x64xf32>,
    %80 = arith.mulf %74, %74 : vector<64x64xf32>
    %cst_77 = arith.constant dense<0.000000e+00> : vector<64xf32>
    %81 = vector.multi_reduction <add>, %80, %cst_77 [0] : vector<64x64xf32> to vector<64xf32>
    %82 = vector.shape_cast %81 : vector<64xf32> to vector<1x64xf32>
    %c0_78 = arith.constant 0 : index
    %c0_79 = arith.constant 0 : index
    %c0_80 = arith.constant 0 : index
    %83 = vector.load %arg13[%c0_78, %c0_79, %c0_80] : memref<1x1x64xf32, #tpu.memory_space<vmem>>, vector<1x1x64xf32>
    %84 = vector.shape_cast %83 : vector<1x1x64xf32> to vector<1x64xf32>
    %85 = vector.shape_cast %82 : vector<1x64xf32> to vector<1x1x64xf32>
    tpu.vector_store %arg13[%c0_78, %c0_79, %c0_80], %85 {strides = array<i32>} : memref<1x1x64xf32, #tpu.memory_space<vmem>>, vector<1x1x64xf32>,
    return
  }
  func.func @transform_0(%arg0: i32) -> (i32, i32, i32, i32) {
    %c0_i32 = arith.constant 0 : i32
    %c0_i32_0 = arith.constant 0 : i32
    %c0_i32_1 = arith.constant 0 : i32
    %c0_i32_2 = arith.constant 0 : i32
    return %arg0, %c0_i32, %c0_i32_0, %c0_i32_1 : i32, i32, i32, i32
  }
  func.func @transform_1(%arg0: i32) -> (i32, i32) {
    %c0_i32 = arith.constant 0 : i32
    %c0_i32_0 = arith.constant 0 : i32
    %c0_i32_1 = arith.constant 0 : i32
    return %c0_i32, %c0_i32_0 : i32, i32
  }
  func.func @transform_2(%arg0: i32) -> (i32, i32) {
    %c0_i32 = arith.constant 0 : i32
    %c0_i32_0 = arith.constant 0 : i32
    %c0_i32_1 = arith.constant 0 : i32
    return %c0_i32, %c0_i32_0 : i32, i32
  }
  func.func @transform_3(%arg0: i32) -> (i32, i32) {
    %c0_i32 = arith.constant 0 : i32
    %c0_i32_0 = arith.constant 0 : i32
    %c0_i32_1 = arith.constant 0 : i32
    return %c0_i32, %c0_i32_0 : i32, i32
  }
  func.func @transform_4(%arg0: i32) -> (i32, i32) {
    %c0_i32 = arith.constant 0 : i32
    %c0_i32_0 = arith.constant 0 : i32
    %c0_i32_1 = arith.constant 0 : i32
    return %c0_i32, %c0_i32_0 : i32, i32
  }
  func.func @transform_5(%arg0: i32) -> (i32, i32) {
    %c0_i32 = arith.constant 0 : i32
    %c0_i32_0 = arith.constant 0 : i32
    %c0_i32_1 = arith.constant 0 : i32
    return %c0_i32, %c0_i32_0 : i32, i32
  }
  func.func @transform_6(%arg0: i32) -> (i32, i32) {
    %c0_i32 = arith.constant 0 : i32
    %c0_i32_0 = arith.constant 0 : i32
    %c0_i32_1 = arith.constant 0 : i32
    return %c0_i32, %c0_i32_0 : i32, i32
  }
  func.func @transform_7(%arg0: i32) -> (i32, i32) {
    %c0_i32 = arith.constant 0 : i32
    %c0_i32_0 = arith.constant 0 : i32
    %c0_i32_1 = arith.constant 0 : i32
    return %c0_i32, %c0_i32_0 : i32, i32
  }
  func.func @transform_8(%arg0: i32) -> (i32, i32) {
    %c0_i32 = arith.constant 0 : i32
    %c0_i32_0 = arith.constant 0 : i32
    %c0_i32_1 = arith.constant 0 : i32
    return %c0_i32, %c0_i32_0 : i32, i32
  }
  func.func @transform_9(%arg0: i32) -> (i32, i32, i32, i32) {
    %c0_i32 = arith.constant 0 : i32
    %c0_i32_0 = arith.constant 0 : i32
    %c0_i32_1 = arith.constant 0 : i32
    %c0_i32_2 = arith.constant 0 : i32
    return %arg0, %c0_i32, %c0_i32_0, %c0_i32_1 : i32, i32, i32, i32
  }
  func.func @transform_10(%arg0: i32) -> (i32, i32, i32, i32) {
    %c0_i32 = arith.constant 0 : i32
    %c0_i32_0 = arith.constant 0 : i32
    %c0_i32_1 = arith.constant 0 : i32
    %c0_i32_2 = arith.constant 0 : i32
    return %arg0, %c0_i32, %c0_i32_0, %c0_i32_1 : i32, i32, i32, i32
  }
  func.func @transform_11(%arg0: i32) -> (i32, i32, i32) {
    %c0_i32 = arith.constant 0 : i32
    %c0_i32_0 = arith.constant 0 : i32
    %c0_i32_1 = arith.constant 0 : i32
    return %arg0, %c0_i32, %c0_i32_0 : i32, i32, i32
  }
  func.func @transform_12(%arg0: i32) -> (i32, i32, i32) {
    %c0_i32 = arith.constant 0 : i32
    %c0_i32_0 = arith.constant 0 : i32
    %c0_i32_1 = arith.constant 0 : i32
    return %arg0, %c0_i32, %c0_i32_0 : i32, i32, i32
  }
}

</mosaic_0001>

<bundles_post_ra>
// kernel: tpu_custom_call.1
= control target key start
LH: loop header
LB: loop body
LE: loop exit
PB: predicated region body
PF: predicated region fallthrough
CT: control target
= control target key end

     0   :  { %s4632_s0 = inlined_call_operand.vmem [shape: f32[2,8,8,32], index: 0, kind: input, shape index: {}]   ;;  %s4633_s1 = inlined_call_operand.vmem [shape: f32[1,32], index: 1, kind: input, shape index: {}]   ;;  %s4634_s2 = inlined_call_operand.vmem [shape: f32[1,32], index: 2, kind: input, shape index: {}]   ;;  %s4635_s3 = inlined_call_operand.vmem [shape: bf16[1152,64], index: 3, kind: input, shape index: {}]   ;;  %s4636_s4 = inlined_call_operand.vmem [shape: f32[1,64], index: 4, kind: input, shape index: {}]   ;;  %s4637_s5 = inlined_call_operand.vmem [shape: f32[1,32], index: 5, kind: input, shape index: {}]   ;;  %s4638_s6 = inlined_call_operand.vmem [shape: f32[1,32], index: 6, kind: input, shape index: {}]   ;;  %s4639_s7 = inlined_call_operand.vmem [shape: bf16[32,64], index: 7, kind: input, shape index: {}]   ;;  %s4640_s8 = inlined_call_operand.vmem [shape: f32[1,64], index: 8, kind: input, shape index: {}]   ;;  %s4641_s9 = inlined_call_operand.hbm [shape: bf16[2,8,8,64], index: 9, kind: output, shape index: {0}]   ;;  %s4642_s10 = inlined_call_operand.hbm [shape: bf16[2,8,8,64], index: 10, kind: output, shape index: {1}]   ;;  %s4643_s11 = inlined_call_operand.hbm [shape: f32[2,1,64], index: 11, kind: output, shape index: {2}]   ;;  %s4644_s12 = inlined_call_operand.hbm [shape: f32[2,1,64], index: 12, kind: output, shape index: {3}]  }
   0x1   :  { %4651 = sst [smem:[#allocation20_spill]] %s4632_s0 }
   0x2   :  { %4652 = sst [smem:[#allocation21_spill]] %s4633_s1 }
   0x3   :  { %4653 = sst [smem:[#allocation22_spill]] %s4634_s2 }
   0x4   :  { %4654 = sst [smem:[#allocation23_spill]] %s4635_s3 }
   0x5   :  { %18 = vsyncpa [#allocation5], 0 }
   0x6   :  { %20 = vsyncpa [#allocation5 + $0x1], 0 }
   0x7   :  { %21 = vsyncpa [#allocation7], 0 }
   0x8   :  { %23 = vsyncpa [#allocation7 + $0x1], 0 }
   0x9   :  { %24 = vsyncpa [#allocation10], 0 }
   0xa   :  { %26 = vsyncpa [#allocation10 + $0x1], 0  ;;  %s3815_s21 = smov 0   ;;  %s3817_s22 = smov 0  }
   0xb   :  { %s3819_s23 = smov 0   ;;  %s3821_s24 = smov 0  }
   0xc LB: > { %s3836_s25 = sadd.s32 4294967295, %s3741_s24   ;;  %s4645_s26 = sadd.s32 4294967294, %s3741_s24   ;;  %s3741_s24 = sphi %s3821_s24, %s4690_s24   ;;  %s3737_s23 = sphi %s3819_s23, %s4689_s23   ;;  %s3733_s22 = sphi %s3817_s22, %s4688_s22   ;;  %s3729_s21 = sphi %s3815_s21, %s4687_s21  }
   0xd   : > { %s3840_s27 = sadd.s32 1, %s3741_s24   ;;  %s233_s28 = sadd.s32 1, %s3737_s23 }
   0xe   : > { %s230_s29 = ssub.s32 %s3741_s24, %s3840_s27  ;;  %p243_p0 = scmp.ne.s32.totalorder %s3737_s23, %s3733_s22 }
   0xf   : > { %p231_p1 = scmp.eq.s32.totalorder %s230_s29, 0  ;;  %p244_p2 = scmp.eq.s32.totalorder %s3836_s25, 1 }
  0x10   : > { %p249_p3 = scmp.ne.s32.totalorder %s3733_s22, %s3729_s21  ;;  %p250_p4 = scmp.eq.s32.totalorder %s4645_s26, 1 }
  0x11   : > { %s3853_s30 = scalar_select %p231_p1, %s3737_s23, %s233_s28  }
  0x12   : > { %p3855_p5 = por %p244_p2, %p243_p0  ;;  %p3859_p6 = por %p250_p4, %p249_p3 }
  0x13   : > { %4655 = sst [smem:[#allocation14_spill]] %s3853_s30  ;;  %p3004_p7 = scmp.ge.s32.totalorder %s3741_s24, 1 }
  0x14   : > { %p378_p8 = scmp.lt.s32.totalorder %s3741_s24, 3 }
  0x16   : > { %p379_p9 = pnand %p3004_p7, %p378_p8 }
  0x18   : > { %382 = sbr.rel (%p379_p9) target bundleno = 472 (0x1d8), region = 56 }
  0x1d   : > { %v3469_v0 = vld [vmem:[%s4639_s7 + $0x8] sm:$0xff]   ;;  %p433_p10 = scmp.lt.s32.totalorder %s3836_s25, 1  ;;  %v3470_v1 = vld [vmem:[%s4639_s7] sm:$0xff]   ;;  %s4658_s3 = sld [smem:[#allocation23_spill]]  ;;  %v3743_v5 = vmov 0   ;;  %vm504_vm0 = vcmask 261120  }
  0x1e   : > { %3376 = vmatprep.subr.bf16.mxu0 %v3469_v0  ;;  %v3885_v4 = vld [vmem:[%s4637_s5] ss:$0 sm:$0xff]  ;;  %639 = vst [vmem:[#allocation2 + $0x8] sm:$0xf] %v3743_v5  ;;  %640 = vst [vmem:[#allocation2 + $0xc] sm:$0x1] %v3743_v5 }
  0x1f   : > { %s3876_s28 = scalar_select %p433_p10, %s3836_s25, 1  ;;  %3377 = vmatpush3.bf16.msra.mxu0 %v3469_v0  ;;  %641 = vst [vmem:[#allocation2 + $0x10] sm:$0xf] %v3743_v5  ;;  %642 = vst [vmem:[#allocation2 + $0x14] sm:$0x1] %v3743_v5  ;;  %vm770_vm1 = vcmask 257024  }
  0x20   : > { %3378 = vmatprep.subr.bf16.mxu0 %v3470_v1  ;;  %637 = vst [vmem:[#allocation2] sm:$0xf] %v3743_v5  ;;  %638 = vst [vmem:[#allocation2 + $0x4] sm:$0x1] %v3743_v5  ;;  %s4659_s0 = sld [smem:[#allocation20_spill]]  ;;  %vm776_vm3 = vcmask 253952  }
  0x21   : > { %s3179_s15 = sshll.u32 %s3876_s28, 6  ;;  %643 = vst [vmem:[#allocation2 + $0x18] sm:$0xf] %v3743_v5  ;;  %644 = vst [vmem:[#allocation2 + $0x1c] sm:$0x1] %v3743_v5  ;;  %s4660_s1 = sld [smem:[#allocation21_spill]] }
  0x22   : > { %645 = vst [vmem:[#allocation2 + $0x20] sm:$0xf] %v3743_v5  ;;  %646 = vst [vmem:[#allocation2 + $0x24] sm:$0x1] %v3743_v5  ;;  %v3895_v6 = vld [vmem:[%s4638_s6] ss:$0 sm:$0xff] }
  0x23   : > { %v3471_v2 = vld [vmem:[%s4658_s3 + $0x78] sm:$0xff]   ;;  %647 = vst [vmem:[#allocation2 + $0x28] sm:$0xf] %v3743_v5  ;;  %648 = vst [vmem:[#allocation2 + $0x2c] sm:$0x1] %v3743_v5  ;;  %s4661_s2 = sld [smem:[#allocation22_spill]]  ;;  %3379 = vmatpush3.bf16.msra.mxu0 %v3470_v1 }
  0x24   : > { %v3472_v3 = vld [vmem:[%s4658_s3 + $0x38] sm:$0xff]   ;;  %3204 = vmatprep.subr.bf16.mxu1 %v3471_v2  ;;  %649 = vst [vmem:[#allocation2 + $0x30] sm:$0xf] %v3743_v5  ;;  %650 = vst [vmem:[#allocation2 + $0x34] sm:$0x1] %v3743_v5  ;;  %v3474_v22 = vld [vmem:[%s4658_s3 + $0x70] sm:$0xff]  }
  0x25   : > { %651 = vst [vmem:[#allocation2 + $0x38] sm:$0xf] %v3743_v5  ;;  %652 = vst [vmem:[#allocation2 + $0x3c] sm:$0x1] %v3743_v5  ;;  %3205 = vmatpush3.bf16.msra.mxu1 %v3472_v3  ;;  %v3473_v15 = vld [vmem:[%s4658_s3 + $0xf8] sm:$0xff]   ;;  %v3476_v45 = vld [vmem:[%s4658_s3 + $0x30] sm:$0xff]  }
  0x26   : > { %653 = vst [vmem:[#allocation2 + $0x40] sm:$0xf] %v3743_v5  ;;  %654 = vst [vmem:[#allocation2 + $0x44] sm:$0x1] %v3743_v5  ;;  %s3890_s17 = scalar_lea.vmem %s4659_s0, %s3179_s15  ;;  %3244 = vmatprep.subr.bf16.mxu0 %v3473_v15  ;;  %vm771_vm2 = vsmask.f32 7938  ;;  %3206 = vmatprep.subr.bf16.mxu1 %v3474_v22 }
  0x27   : > { %655 = vst [vmem:[#allocation2 + $0x48] sm:$0xf] %v3743_v5  ;;  %656 = vst [vmem:[#allocation2 + $0x4c] sm:$0x1] %v3743_v5  ;;  %v3900_v7 = vld [vmem:[%s4660_s1] ss:$0 sm:$0xff] }
  0x28   : > { %v439_v8 = vld [vmem:[%s3890_s17] sm:$0xff]  ;;  %v440_v9 = vld [vmem:[%s3890_s17 + $0x8] sm:$0xff]  ;;  %v441_v16 = vld [vmem:[%s3890_s17 + $0x10] sm:$0xff]  ;;  %vm777_vm4 = vsmask.f32 256  ;;  %vm1019_vm7 = vcmask 1042432  }
  0x29   : > { %v3907_v10 = vld [vmem:[%s4661_s2] ss:$0 sm:$0xff]  ;;  %v454_v11 = vmul.f32 %v3885_v4, %v439_v8  ;;  %v455_v12 = vmul.f32 %v3885_v4, %v440_v9  ;;  %v606_v13 = vmul.f32 %v3900_v7, %v439_v8  ;;  %v607_v14 = vmul.f32 %v3900_v7, %v440_v9  ;;  %v442_v17 = vld [vmem:[%s3890_s17 + $0x18] sm:$0xff]  ;;  %vm3939_vm5 = vmand %vm770_vm1, %vm771_vm2  ;;  %3207 = vmatpush3.bf16.msra.mxu1 %v3476_v45  ;;  %s4318_s18 = sand.u32 1, %s3733_s22   ;;  %s2790_s16 = sand.u32 1, %s3836_s25  }
  0x2a   : > { %v456_v23 = vmul.f32 %v3885_v4, %v441_v16  ;;  %v457_v24 = vmul.f32 %v3885_v4, %v442_v17  ;;  %v608_v25 = vmul.f32 %v3900_v7, %v441_v16  ;;  %v609_v26 = vmul.f32 %v3900_v7, %v442_v17  ;;  %v3475_v36 = vld [vmem:[%s4658_s3 + $0xb8] sm:$0xff]   ;;  %v3477_v46 = vld [vmem:[%s4658_s3 + $0xf0] sm:$0xff]   ;;  %v773_v47 = vld [vmem:[#allocation2 + $0x8] sm:$0xf]  ;;  %s4647_s28 = sshll.u32 %s4318_s18, 5  ;;  %s4646_s15 = sshll.u32 %s3836_s25, 9 }
  0x2b   : > { %v469_v18 = vadd.f32 %v3895_v6, %v454_v11  ;;  %v470_v19 = vadd.f32 %v3895_v6, %v455_v12  ;;  %v621_v20 = vadd.f32 %v3907_v10, %v606_v13  ;;  %v622_v21 = vadd.f32 %v3907_v10, %v607_v14  ;;  %v779_v48 = vld [vmem:[#allocation2 + $0xc] sm:$0x1]  ;;  %v782_v49 = vld [vmem:[#allocation2 + $0x10] sm:$0xf]  ;;  %v785_v50 = vld [vmem:[#allocation2 + $0x14] sm:$0x1] }
  0x2c   : > { %v471_v30 = vadd.f32 %v3895_v6, %v456_v23  ;;  %v472_v31 = vadd.f32 %v3895_v6, %v457_v24  ;;  %v623_v32 = vadd.f32 %v3907_v10, %v608_v25  ;;  %v624_v33 = vadd.f32 %v3907_v10, %v609_v26  ;;  %v3478_v55 = vld [vmem:[%s4658_s3 + $0x68] sm:$0xff]   ;;  %v3479_v56 = vld [vmem:[%s4658_s3 + $0xb0] sm:$0xff]   ;;  %vm3958_vm6 = vmand %vm776_vm3, %vm777_vm4  ;;  %s4326_s29 = scalar_lea.vmem [#allocation6], %s4647_s28  ;;  %s4380_s19 = scalar_lea.sflag [#allocation7], %s2790_s16 }
  0x2d   : > { %v477_v27 = vpack.c.bf16 %v470_v19, %v469_v18  ;;  %v629_v28 = vmax.f32 %v621_v20, 0.0  ;;  %v630_v29 = vmax.f32 %v622_v21, 0.0  ;;  %v788_v2 = vld [vmem:[#allocation2 + $0x18] sm:$0xf]  ;;  %v791_v3 = vld [vmem:[#allocation2 + $0x1c] sm:$0x1]  ;;  %3208 = vmatprep.subr.bf16.mxu1 %v3478_v55 }
  0x2e   : > { %v478_v37 = vpack.c.bf16 %v472_v31, %v471_v30  ;;  %v631_v38 = vmax.f32 %v623_v32, 0.0  ;;  %v632_v39 = vmax.f32 %v624_v33, 0.0  ;;  %v794_v5 = vld [vmem:[#allocation2 + $0x20] sm:$0xf]  ;;  %v797_v8 = vld [vmem:[#allocation2 + $0x24] sm:$0x1] }
  0x2f   : > { %3380 = vmatprep.mubr.msk.bf16.mxu0 %vm504_vm0, %v477_v27  ;;  %v3180_v34 = vpack.c.bf16 %v629_v28, %v629_v28  ;;  %v3181_v35 = vpack.c.bf16 %v630_v29, %v630_v29  ;;  %v3480_v12 = vld [vmem:[%s4658_s3 + $0x28] sm:$0xff]   ;;  %v3482_v22 = vld [vmem:[%s4658_s3 + $0x60] sm:$0xff]   ;;  %v3486_v30 = vld [vmem:[%s4658_s3 + $0x58] sm:$0xff]   ;;  %vm1020_vm8 = vcmask 1046532   ;;  %vm856_vm9 = vsmask.f32 3328 }
  0x30   : > { %3381 = vmatmul.mubr.msk.bf16.vlgmr.msra.gmra.mxu0 %vm504_vm0, %v478_v37  ;;  %v3182_v51 = vpack.c.bf16 %v631_v38, %v631_v38  ;;  %v3183_v52 = vpack.c.bf16 %v632_v39, %v632_v39  ;;  %v3481_v13 = vld [vmem:[%s4658_s3 + $0xe8] sm:$0xff]   ;;  %3209 = vmatpush3.bf16.msra.mxu1 %v3480_v12  ;;  %v3484_v28 = vld [vmem:[%s4658_s3 + $0x20] sm:$0xff]   ;;  %v3488_v32 = vld [vmem:[%s4658_s3 + $0x18] sm:$0xff]   ;;  %vm857_vm10 = vsmask.f32 7440  ;;  %vm590_vm13 = vcmask 519168  }
  0x31   : > { %v690_v40 = vshrl.u32 %v3180_v34, 16  ;;  %v693_v41 = vshll.u32 %v3180_v34, 16  ;;  %v698_v42 = vshrl.u32 %v3181_v35, 16  ;;  %v701_v43 = vshll.u32 %v3181_v35, 16  ;;  %3245 = vmatpush3.bf16.msra.mxu0 %v3475_v36  ;;  %v3483_v23 = vld [vmem:[%s4658_s3 + $0xa8] sm:$0xff]   ;;  %3210 = vmatprep.subr.bf16.mxu1 %v3482_v22  ;;  %v3485_v29 = vld [vmem:[%s4658_s3 + $0xe0] sm:$0xff]   ;;  %vm4093_vm11 = vmor %vm1019_vm7, %vm1020_vm8 }
  0x32   : > { %v706_v58 = vshrl.u32 %v3182_v51, 16  ;;  %v709_v59 = vshll.u32 %v3182_v51, 16  ;;  %v714_v60 = vshrl.u32 %v3183_v52, 16  ;;  %v717_v61 = vshll.u32 %v3183_v52, 16  ;;  %3246 = vmatprep.subr.bf16.mxu0 %v3477_v46  ;;  %v3487_v31 = vld [vmem:[%s4658_s3 + $0xa0] sm:$0xff]   ;;  %v3489_v33 = vld [vmem:[%s4658_s3 + $0xd8] sm:$0xff]   ;;  %vm4099_vm12 = vmor %vm856_vm9, %vm857_vm10 }
  0x33   : > { %v692_v53 = vrot.slane %v690_v40, 7  ;;  %v700_v54 = vrot.slane %v698_v42, 7  ;;  %v3490_v34 = vld [vmem:[%s4658_s3 + $0x50] sm:$0xff]   ;;  %v3491_v35 = vld [vmem:[%s4658_s3 + $0x98] sm:$0xff]   ;;  %v3494_v38 = vld [vmem:[%s4658_s3 + $0x48] sm:$0xff]   ;;  %s2828_s0 = sshll.u32 %s4326_s29, 4  ;;  %s4378_s0 = int_to_ptr.vmem [resolvable:$true] %s2828_s0 }
  0x34   : > { %v708_v9 = vrot.slane %v706_v58, 7  ;;  %v716_v11 = vrot.slane %v714_v60, 7  ;;  %3211 = vmatpush3.bf16.msra.mxu1 %v3484_v28  ;;  %v3492_v36 = vld [vmem:[%s4658_s3 + $0x10] sm:$0xff]   ;;  %v3496_v40 = vld [vmem:[%s4658_s3 + $0x8] sm:$0xff]   ;;  %v446_v51 = vld [vmem:[%s3890_s17 + $0x38] sm:$0xff]  ;;  %s3595_s20 = scalar_lea.vmem %s4378_s0, 512 }
  0x35   : > { %v695_v62 = vor.u32 %v693_v41, %v692_v53  ;;  %v696_v63 = vrot.slane %v692_v53, 4  ;;  %v703_v0 = vor.u32 %v701_v43, %v700_v54  ;;  %v704_v1 = vrot.slane %v700_v54, 4  ;;  %3247 = vmatpush3.bf16.msra.mxu0 %v3479_v56  ;;  %3212 = vmatprep.subr.bf16.mxu1 %v3486_v30  ;;  %v3493_v37 = vld [vmem:[%s4658_s3 + $0xd0] sm:$0xff]   ;;  %v443_v41 = vld [vmem:[%s3890_s17 + $0x20] sm:$0xff]  ;;  %v444_v42 = vld [vmem:[%s3890_s17 + $0x28] sm:$0xff]  ;;  %p3596_p11 = scmp.ne.s32.totalorder %s4378_s0, %s3595_s20  ;;  %s3744_s26 = smov [#allocation6]  }
  0x36   : > { %v711_v18 = vor.u32 %v709_v59, %v708_v9  ;;  %v712_v19 = vrot.slane %v708_v9, 4  ;;  %v719_v20 = vor.u32 %v717_v61, %v716_v11  ;;  %v720_v21 = vrot.slane %v716_v11, 4  ;;  %3248 = vmatprep.subr.bf16.mxu0 %v3481_v13  ;;  %v3495_v39 = vld [vmem:[%s4658_s3 + $0x90] sm:$0xff]   ;;  %v3505_v28 = vld [vmem:[%s4658_s3 + $0x80] sm:$0xff]   ;;  %s3599_s30 = sshll.u32 %s3744_s26, 4  ;;  %s3600_s30 = int_to_ptr.vmem [resolvable:$false] %s3599_s30 }
  0x37   : > { %v774_v14 = vsel %vm3939_vm5, %v695_v62, %v773_v47  ;;  %v780_v15 = vsel %vm3958_vm6, %v696_v63, %v779_v48  ;;  %v783_v16 = vsel %vm3939_vm5, %v703_v0, %v782_v49  ;;  %v786_v17 = vsel %vm3958_vm6, %v704_v1, %v785_v50  ;;  %v445_v48 = vld [vmem:[%s3890_s17 + $0x30] sm:$0xff]  ;;  %v3497_v62 = vld [vmem:[%s4658_s3 + $0xc8] sm:$0xff]   ;;  %s4371_s17 = scalar_lea.hbm %s4642_s10, %s4646_s15  ;;  %p3597_p12 = pnand %p3596_p11, %p3855_p5 }
  0x38   : > { %775 = vst [vmem:[#allocation2 + $0x8] sm:$0xf] %v774_v14  ;;  %781 = vst [vmem:[#allocation2 + $0xc] sm:$0x1] %v780_v15  ;;  %v789_v24 = vsel %vm3939_vm5, %v711_v18, %v788_v2  ;;  %v792_v25 = vsel %vm3958_vm6, %v712_v19, %v791_v3  ;;  %v795_v26 = vsel %vm3939_vm5, %v719_v20, %v794_v5  ;;  %3213 = vmatpush3.bf16.msra.mxu1 %v3488_v32  ;;  %v3499_v5 = vld [vmem:[%s4658_s3 + $0x88] sm:$0xff]   ;;  %v3501_v14 = vld [vmem:[%s4658_s3 + $0xc0] sm:$0xff]   ;;  %p3602_p0 = scmp.lt.s32.totalorder %s4378_s0, %s3600_s30 }
  0x39   : > { %784 = vst [vmem:[#allocation2 + $0x10] sm:$0xf] %v783_v16  ;;  %787 = vst [vmem:[#allocation2 + $0x14] sm:$0x1] %v786_v17  ;;  %v798_v27 = vsel %vm3958_vm6, %v720_v21, %v797_v8  ;;  %3249 = vmatpush3.bf16.msra.mxu0 %v3483_v23  ;;  %3214 = vmatprep.subr.bf16.mxu1 %v3490_v34  ;;  %v458_v43 = vmul.f32 %v3885_v4, %v443_v41  ;;  %v800_v17 = vld [vmem:[#allocation2 + $0x28] sm:$0xf]  ;;  %p3598_p13 = pneg %p3597_p12 }
  0x3a   : > { %790 = vst [vmem:[#allocation2 + $0x18] sm:$0xf] %v789_v24  ;;  %793 = vst [vmem:[#allocation2 + $0x1c] sm:$0x1] %v792_v25  ;;  %3250 = vmatprep.subr.bf16.mxu0 %v3485_v29  ;;  %v610_v45 = vmul.f32 %v3900_v7, %v443_v41  ;;  %v459_v46 = vmul.f32 %v3885_v4, %v444_v42  ;;  %v611_v47 = vmul.f32 %v3900_v7, %v444_v42  ;;  %v803_v18 = vld [vmem:[#allocation2 + $0x2c] sm:$0x1] }
  0x3b   : > { %796 = vst [vmem:[#allocation2 + $0x20] sm:$0xf] %v795_v26  ;;  %799 = vst [vmem:[#allocation2 + $0x24] sm:$0x1] %v798_v27  ;;  %v473_v49 = vadd.f32 %v3895_v6, %v458_v43  ;;  %v460_v52 = vmul.f32 %v3885_v4, %v445_v48  ;;  %v612_v53 = vmul.f32 %v3900_v7, %v445_v48  ;;  %v824_v20 = vld [vmem:[#allocation2] sm:$0xf] }
  0x3c   : > { %3215 = vmatpush3.bf16.msra.mxu1 %v3492_v36  ;;  %v625_v50 = vadd.f32 %v3907_v10, %v610_v45  ;;  %v474_v54 = vadd.f32 %v3895_v6, %v459_v46  ;;  %v626_v55 = vadd.f32 %v3907_v10, %v611_v47  ;;  %v461_v56 = vmul.f32 %v3885_v4, %v446_v51  ;;  %v3498_v4 = vld [vmem:[%s4658_s3 + $0x40] sm:$0xff]   ;;  %v806_v23 = vld [vmem:[#allocation2 + $0x30] sm:$0xf]  ;;  %v809_v24 = vld [vmem:[#allocation2 + $0x34] sm:$0x1]  ;;  %s3601_s15 = scalar_lea.vmem %s3600_s30, 1024 }
  0x3d   : > { %3251 = vmatpush3.bf16.msra.mxu0 %v3487_v31  ;;  %3216 = vmatprep.subr.bf16.mxu1 %v3494_v38  ;;  %v613_v58 = vmul.f32 %v3900_v7, %v446_v51  ;;  %v475_v60 = vadd.f32 %v3895_v6, %v460_v52  ;;  %v627_v61 = vadd.f32 %v3907_v10, %v612_v53  ;;  %v840_v27 = vld [vmem:[#allocation2] sm:$0xf]  ;;  %v812_v32 = vld [vmem:[#allocation2 + $0x38] sm:$0xf]  ;;  %p3603_p1 = scmp.lt.s32.totalorder %s3601_s15, %s3595_s20 }
  0x3e   : > { %3252 = vmatprep.subr.bf16.mxu0 %v3489_v33  ;;  %v633_v59 = vmax.f32 %v625_v50, 0.0  ;;  %v479_v63 = vpack.c.bf16 %v474_v54, %v473_v49  ;;  %v634_v0 = vmax.f32 %v626_v55, 0.0  ;;  %v476_v1 = vadd.f32 %v3895_v6, %v461_v56  ;;  %v3500_v6 = vld [vmem:[%s4658_s3] sm:$0xff]   ;;  %832 = vst [vmem:[#allocation3] sm:$0xf] %v824_v20  ;;  %v3506_v48 = vld [vmem:[%s4658_s3 + $0x178] sm:$0xff]  }
  0x3f   : > { %v628_v2 = vadd.f32 %v3907_v10, %v613_v58  ;;  %v635_v3 = vmax.f32 %v627_v61, 0.0  ;;  %v825_v21 = vld [vmem:[#allocation2 + $0x8] sm:$0xf]  ;;  %v815_v33 = vld [vmem:[#allocation2 + $0x3c] sm:$0x1]  ;;  %v860_v34 = vshrl.u32 %v840_v27, 16  ;;  %p3604_p2 = por %p3603_p1, %p3602_p0 }
  0x40   : > { %3217 = vmatpush3.bf16.msra.mxu1 %v3496_v40  ;;  %v3184_v7 = vpack.c.bf16 %v633_v59, %v633_v59  ;;  %3384 = vmatprep.mubr.msk.bf16.mxu0 %vm504_vm0, %v479_v63  ;;  %v3185_v8 = vpack.c.bf16 %v634_v0, %v634_v0  ;;  %v480_v9 = vpack.c.bf16 %v476_v1, %v475_v60  ;;  %v818_v38 = vld [vmem:[#allocation2 + $0x40] sm:$0xf]  ;;  %v841_v40 = vld [vmem:[#allocation2 + $0x4] sm:$0x1]  ;;  %v842_v41 = vld [vmem:[#allocation2 + $0x8] sm:$0xf] }
  0x41   : > { %3253 = vmatpush3.bf16.msra.mxu0 %v3491_v35  ;;  %v636_v11 = vmax.f32 %v628_v2, 0.0  ;;  %3218 = vmatprep.subr.bf16.mxu1 %v3498_v4  ;;  %v3186_v13 = vpack.c.bf16 %v635_v3, %v635_v3  ;;  %833 = vst [vmem:[#allocation3 + $0x24] sm:$0xf] %v825_v21  ;;  %v843_v46 = vld [vmem:[#allocation2 + $0xc] sm:$0x1]  ;;  %v862_v47 = vrot.slane %v860_v34, 4  ;;  %p3605_p3 = pnand %p3604_p2, %p3598_p13 }
  0x42   : > { %3254 = vmatprep.subr.bf16.mxu0 %v3493_v37  ;;  %v722_v10 = vshrl.u32 %v3184_v7, 16  ;;  %v725_v12 = vshll.u32 %v3184_v7, 16  ;;  %v730_v15 = vshrl.u32 %v3185_v8, 16  ;;  %v733_v16 = vshll.u32 %v3185_v8, 16  ;;  %3385 = vmatmul.mubr.msk.bf16.gmra.mxu0 %vm504_vm0, %v480_v9  ;;  %v3511_v58 = vld [vmem:[%s4658_s3 + $0x1f8] sm:$0xff]  }
  0x43   : > { %v3187_v19 = vpack.c.bf16 %v636_v11, %v636_v11  ;;  %v738_v25 = vshrl.u32 %v3186_v13, 16  ;;  %v741_v26 = vshll.u32 %v3186_v13, 16  ;;  %v863_v61 = vshll.u32 %v840_v27, 16  ;;  %v987_v63 = vld [vmem:[#allocation2] sm:$0xe] }
  0x44   : > { %3219 = vmatpush3.bf16.msra.mxu1 %v3500_v6  ;;  %v724_v22 = vrot.slane %v722_v10, 7  ;;  %v732_v29 = vrot.slane %v730_v15, 7  ;;  %v874_v2 = vshrl.u32 %v842_v41, 16  ;;  %v877_v4 = vshll.u32 %v842_v41, 16  ;;  %v988_v7 = vld [vmem:[#allocation2 + $0x4] sm:$0x1] }
  0x45   : > { %3255 = vmatpush3.bf16.msra.mxu0 %v3495_v39  ;;  %v746_v30 = vshrl.u32 %v3187_v19, 16  ;;  %v749_v31 = vshll.u32 %v3187_v19, 16  ;;  %v740_v37 = vrot.slane %v738_v25, 7  ;;  %v821_v39 = vld [vmem:[#allocation2 + $0x44] sm:$0x1]  ;;  %3284 = vmatprep.subr.bf16.mxu1 %v3506_v48  ;;  %v883_v9 = vshll.u32 %v843_v46, 16 }
  0x46   : > { %3256 = vmatprep.subr.bf16.mxu0 %v3497_v62  ;;  %v727_v35 = vor.u32 %v725_v12, %v724_v22  ;;  %v728_v36 = vrot.slane %v724_v22, 4  ;;  %v735_v42 = vor.u32 %v733_v16, %v732_v29  ;;  %v736_v43 = vrot.slane %v732_v29, 4  ;;  %v989_v3 = vld [vmem:[#allocation2 + $0x8] sm:$0xe]  ;;  %v990_v11 = vld [vmem:[#allocation2 + $0xc] sm:$0x1] }
  0x47   : > { %v748_v45 = vrot.slane %v746_v30, 7  ;;  %v743_v51 = vor.u32 %v741_v26, %v740_v37  ;;  %v744_v52 = vrot.slane %v740_v37, 4  ;;  %v869_v62 = vshll.u32 %v841_v40, 16  ;;  %v1071_v19 = vld [vmem:[#allocation2 + $0x10] sm:$0xf] }
  0x48   : > { %v801_v49 = vsel %vm3939_vm5, %v727_v35, %v800_v17  ;;  %v804_v50 = vsel %vm3958_vm6, %v728_v36, %v803_v18  ;;  %v807_v53 = vsel %vm3939_vm5, %v735_v42, %v806_v23  ;;  %v810_v54 = vsel %vm3958_vm6, %v736_v43, %v809_v24  ;;  %1079 = vst [vmem:[#allocation3 + $0x30] sm:$0xf] %v1071_v19  ;;  %v826_v27 = vld [vmem:[#allocation2 + $0x10] sm:$0xf]  ;;  %v845_v30 = vld [vmem:[#allocation2 + $0x14] sm:$0x1] }
  0x49   : > { %3257 = vmatpush3.bf16.msra.mxu0 %v3499_v5  ;;  %802 = vst [vmem:[#allocation2 + $0x28] sm:$0xf] %v801_v49  ;;  %805 = vst [vmem:[#allocation2 + $0x2c] sm:$0x1] %v804_v50  ;;  %v751_v55 = vor.u32 %v749_v31, %v748_v45  ;;  %v752_v56 = vrot.slane %v748_v45, 4  ;;  %v813_v59 = vsel %vm3939_vm5, %v743_v51, %v812_v32  ;;  %v865_v5 = vrot.slane %v863_v61, 5 }
  0x4a   : > { %3258 = vmatprep.subr.bf16.mxu0 %v3501_v14  ;;  %808 = vst [vmem:[#allocation2 + $0x30] sm:$0xf] %v807_v53  ;;  %811 = vst [vmem:[#allocation2 + $0x34] sm:$0x1] %v810_v54  ;;  %v816_v60 = vsel %vm3958_vm6, %v744_v52, %v815_v33  ;;  %v871_v8 = vrot.slane %v869_v62, 5  ;;  %v3028_v44 = vrot.slane %v987_v63, 9 }
  0x4b   : > { %814 = vst [vmem:[#allocation2 + $0x38] sm:$0xf] %v813_v59  ;;  %817 = vst [vmem:[#allocation2 + $0x3c] sm:$0x1] %v816_v60  ;;  %v819_v0 = vsel %vm3939_vm5, %v751_v55, %v818_v38  ;;  %v822_v1 = vsel %vm3958_vm6, %v752_v56, %v821_v39  ;;  %v876_v57 = vrot.slane %v874_v2, 4  ;;  %v879_v10 = vrot.slane %v877_v4, 5 }
  0x4c   : > { %820 = vst [vmem:[#allocation2 + $0x40] sm:$0xf] %v819_v0  ;;  %823 = vst [vmem:[#allocation2 + $0x44] sm:$0x1] %v822_v1  ;;  %v1024_v12 = vrot.slane %v988_v7, 5  ;;  %v3029_v13 = vrot.slane %v989_v3, 9  ;;  %v866_v16 = vor.u32 %v865_v5, %v862_v47 }
  0x4d   : > { %3259 = vmatpush3.bf16.msra.mxu0 %v3505_v28  ;;  %v1070_v14 = vld [vmem:[#allocation2 + $0x8] sm:$0xf]  ;;  %v885_v17 = vrot.slane %v883_v9, 5  ;;  %v1028_v18 = vrot.slane %v990_v11, 5  ;;  %v880_v20 = vor.u32 %v879_v10, %v876_v57  ;;  %v827_v28 = vld [vmem:[#allocation2 + $0x18] sm:$0xf] }
  0x4e   : > { %3324 = vmatprep.subr.bf16.mxu0 %v3511_v58  ;;  %1078 = vst [vmem:[#allocation3 + $0xc] sm:$0xf] %v1070_v14  ;;  %v1025_v21 = vsel %vm4093_vm11, %v3028_v44, %v1024_v12  ;;  %v867_v22 = vrot.slane %v866_v16, 4  ;;  %834 = vst [vmem:[#allocation3 + $0x48] sm:$0xf] %v826_v27  ;;  %v897_v35 = vshll.u32 %v845_v30, 16 }
  0x4f   : > { %v1029_v23 = vsel %vm4093_vm11, %v3029_v13, %v1028_v18  ;;  %1062 = vst [vmem:[#allocation3 + $0x8] sm:$0xf] %v1025_v21  ;;  %v881_v24 = vrot.slane %v880_v20, 4  ;;  %835 = vst [vmem:[#allocation3 + $0x6c] sm:$0xf] %v827_v28  ;;  %v3513_v39 = vld [vmem:[%s4658_s3 + $0x1b8] sm:$0xff]  }
  0x50   : > { %1063 = vst [vmem:[#allocation3 + $0x2c] sm:$0xf] %v1029_v23  ;;  %v872_v25 = vsel %vm4099_vm12, %v867_v22, %v871_v8  ;;  %v844_v29 = vld [vmem:[#allocation2 + $0x10] sm:$0xf]  ;;  %v846_v31 = vld [vmem:[#allocation2 + $0x18] sm:$0xf] }
  0x51   : > { %v886_v26 = vsel %vm4099_vm12, %v881_v24, %v885_v17  ;;  %979 = vst [vmem:[#allocation3 + $0x4] sm:$0xf] %v872_v25  ;;  %v847_v32 = vld [vmem:[#allocation2 + $0x1c] sm:$0x1]  ;;  %v888_v33 = vshrl.u32 %v844_v29, 16  ;;  %v891_v34 = vshll.u32 %v844_v29, 16 }
  0x52   : > { %980 = vst [vmem:[#allocation3 + $0x28] sm:$0xf] %v886_v26  ;;  %v902_v36 = vshrl.u32 %v846_v31, 16  ;;  %v905_v37 = vshll.u32 %v846_v31, 16  ;;  %v911_v38 = vshll.u32 %v847_v32, 16  ;;  %v3507_v47 = vld [vmem:[%s4658_s3 + $0x138] sm:$0xff]  }
  0x53   : > { %v890_v40 = vrot.slane %v888_v33, 4  ;;  %v893_v41 = vrot.slane %v891_v34, 5  ;;  %v3515_v48 = vld [vmem:[%s4658_s3 + $0x1f0] sm:$0xff]   ;;  %v899_v50 = vrot.slane %v897_v35, 5  ;;  %v993_v0 = vld [vmem:[#allocation2 + $0x18] sm:$0xe] }
  0x54   : > { %v904_v42 = vrot.slane %v902_v36, 4  ;;  %v907_v46 = vrot.slane %v905_v37, 5  ;;  %v3512_v51 = vld [vmem:[%s4658_s3 + $0x170] sm:$0xff]   ;;  %v913_v53 = vrot.slane %v911_v38, 5  ;;  %v994_v1 = vld [vmem:[#allocation2 + $0x1c] sm:$0x1] }
  0x55   : > { %v3510_v45 = vld [vmem:[#allocation3 + $0xc] ss:$36 sps:$4 sm:$0xff]   ;;  %v894_v49 = vor.u32 %v893_v41, %v890_v40  ;;  %v3502_v54 = vld [vmem:[#allocation3] ss:$36 sps:$4 sm:$0xff]   ;;  %v3031_v3 = vrot.slane %v993_v0, 9  ;;  %v1036_v5 = vrot.slane %v994_v1, 5 }
  0x56   : > { %2455 = vmatprep.mubr.bf16.mxu0 %v3510_v45  ;;  %v908_v52 = vor.u32 %v907_v46, %v904_v42  ;;  %v3519_v59 = vld [vmem:[%s4658_s3 + $0x1b0] sm:$0xff]   ;;  %v1072_v8 = vld [vmem:[#allocation2 + $0x18] sm:$0xf]  ;;  %v1073_v9 = vld [vmem:[#allocation2 + $0x20] sm:$0xf] }
  0x57   : > { %v3508_v43 = vld [vmem:[#allocation3 + $0x8] ss:$36 sps:$4 sm:$0xff]   ;;  %v895_v56 = vrot.slane %v894_v49, 4  ;;  %v991_v60 = vld [vmem:[#allocation2 + $0x10] sm:$0xe]  ;;  %v3525_v44 = vld [vmem:[%s4658_s3 + $0x1e8] sm:$0xff]   ;;  %v1037_v10 = vsel %vm4093_vm11, %v3031_v3, %v1036_v5 }
  0x58   : > { %2456 = vmatmul.mubr.bf16.vlgmr.msra.gmra.mxu0 %v3508_v43  ;;  %v909_v58 = vrot.slane %v908_v52, 4  ;;  %v992_v61 = vld [vmem:[#allocation2 + $0x14] sm:$0x1]  ;;  %v3030_v2 = vrot.slane %v991_v60, 9  ;;  %1080 = vst [vmem:[#allocation3 + $0x54] sm:$0xf] %v1072_v8 }
  0x59   : > { %v3504_v55 = vld [vmem:[#allocation3 + $0x4] ss:$36 sps:$4 sm:$0xff]   ;;  %3325 = vmatpush3.bf16.msra.mxu0 %v3513_v39  ;;  %v900_v63 = vsel %vm4099_vm12, %v895_v56, %v899_v50  ;;  %v1032_v4 = vrot.slane %v992_v61, 5  ;;  %1081 = vst [vmem:[#allocation3 + $0x78] sm:$0xf] %v1073_v9  ;;  %v3518_v57 = vld [vmem:[%s4658_s3 + $0x168] sm:$0xff]  }
  0x5a   : > { %2390 = vmatprep.mubr.bf16.mxu1 %v3504_v55  ;;  %v3514_v62 = vld [vmem:[%s4658_s3 + $0x130] sm:$0xff]   ;;  %3326 = vmatprep.subr.bf16.mxu0 %v3515_v48  ;;  %v914_v7 = vsel %vm4099_vm12, %v909_v58, %v913_v53  ;;  %981 = vst [vmem:[#allocation3 + $0x4c] sm:$0xf] %v900_v63  ;;  %v3521_v12 = vld [vmem:[%s4658_s3 + $0x128] sm:$0xff]   ;;  %1065 = vst [vmem:[#allocation3 + $0x74] sm:$0xf] %v1037_v10 }
  0x5b   : > { %2391 = vmatmul.mubr.bf16.vlgmr.msra.gmra.mxu1 %v3502_v54  ;;  %982 = vst [vmem:[#allocation3 + $0x70] sm:$0xf] %v914_v7  ;;  %v1033_v11 = vsel %vm4093_vm11, %v3030_v2, %v1032_v4  ;;  %v3527_v13 = vld [vmem:[%s4658_s3 + $0x1a8] sm:$0xff]   ;;  %v3526_v14 = vld [vmem:[%s4658_s3 + $0x160] sm:$0xff]   ;;  %v3520_v25 = vld [vmem:[#allocation3 + $0x48] ss:$36 sps:$4 sm:$0xff]  }
  0x5c   : > { %3285 = vmatpush3.bf16.msra.mxu1 %v3507_v47  ;;  %1064 = vst [vmem:[#allocation3 + $0x50] sm:$0xf] %v1033_v11  ;;  %v3529_v16 = vld [vmem:[%s4658_s3 + $0x1e0] sm:$0xff]   ;;  %v829_v18 = vld [vmem:[#allocation2 + $0x28] sm:$0xf]  ;;  %v3532_v39 = vld [vmem:[%s4658_s3 + $0x158] sm:$0xff]  }
  0x5d   : > { %3286 = vmatprep.subr.bf16.mxu1 %v3512_v51  ;;  %3327 = vmatpush3.bf16.msra.mxu0 %v3519_v59  ;;  %v828_v17 = vld [vmem:[#allocation2 + $0x20] sm:$0xf]  ;;  %837 = vst [vmem:[#allocation3 + $0xb4] sm:$0xf] %v829_v18  ;;  %v849_v21 = vld [vmem:[#allocation2 + $0x24] sm:$0x1] }
  0x5e   : > { %3328 = vmatprep.subr.bf16.mxu0 %v3525_v44  ;;  %v848_v19 = vld [vmem:[#allocation2 + $0x20] sm:$0xf]  ;;  %836 = vst [vmem:[#allocation3 + $0x90] sm:$0xf] %v828_v17  ;;  %v850_v22 = vld [vmem:[#allocation2 + $0x28] sm:$0xf] }
  0x5f   : > { %v3528_v20 = vld [vmem:[%s4658_s3 + $0x120] sm:$0xff]   ;;  %v916_v23 = vshrl.u32 %v848_v19, 16  ;;  %v919_v26 = vshll.u32 %v848_v19, 16  ;;  %v851_v27 = vld [vmem:[#allocation2 + $0x2c] sm:$0x1]  ;;  %v925_v29 = vshll.u32 %v849_v21, 16 }
  0x60   : > { %3287 = vmatpush3.bf16.msra.mxu1 %v3514_v62  ;;  %v930_v30 = vshrl.u32 %v850_v22, 16  ;;  %v3522_v31 = vld [vmem:[#allocation3 + $0x54] ss:$36 sps:$4 sm:$0xff]   ;;  %v933_v35 = vshll.u32 %v850_v22, 16  ;;  %v939_v36 = vshll.u32 %v851_v27, 16  ;;  %v3535_v43 = vld [vmem:[%s4658_s3 + $0x118] sm:$0xff]  }
  0x61   : > { %3288 = vmatprep.subr.bf16.mxu1 %v3518_v57  ;;  %3329 = vmatpush3.bf16.msra.mxu0 %v3527_v13  ;;  %v918_v28 = vrot.slane %v916_v23, 4  ;;  %v921_v33 = vrot.slane %v919_v26, 5  ;;  %v927_v38 = vrot.slane %v925_v29, 5  ;;  %v3533_v42 = vld [vmem:[%s4658_s3 + $0x1a0] sm:$0xff]   ;;  %v3539_v46 = vld [vmem:[%s4658_s3 + $0x1d8] sm:$0xff]   ;;  %v3540_v56 = vld [vmem:[%s4658_s3 + $0x150] sm:$0xff]  }
  0x62   : > { %3330 = vmatprep.subr.bf16.mxu0 %v3529_v16  ;;  %v3516_v24 = vld [vmem:[#allocation3 + $0x4c] ss:$36 sps:$4 sm:$0xff]   ;;  %v932_v34 = vrot.slane %v930_v30, 4  ;;  %2463 = vmatprep.mubr.bf16.mxu0 %v3522_v31  ;;  %v935_v40 = vrot.slane %v933_v35, 5  ;;  %v941_v41 = vrot.slane %v939_v36, 5  ;;  %v3542_v2 = vld [vmem:[%s4658_s3 + $0x110] sm:$0xff]  }
  0x63   : > { %2398 = vmatprep.mubr.bf16.mxu1 %v3516_v24  ;;  %v3524_v32 = vld [vmem:[#allocation3 + $0x50] ss:$36 sps:$4 sm:$0xff]   ;;  %v922_v37 = vor.u32 %v921_v33, %v918_v28  ;;  %v997_v50 = vld [vmem:[#allocation2 + $0x28] sm:$0xe]  ;;  %v998_v52 = vld [vmem:[#allocation2 + $0x2c] sm:$0x1] }
  0x64   : > { %3289 = vmatpush3.bf16.msra.mxu1 %v3521_v12  ;;  %2464 = vmatmul.mubr.bf16.gmra.mxu0 %v3524_v32  ;;  %v936_v47 = vor.u32 %v935_v40, %v932_v34  ;;  %v995_v48 = vld [vmem:[#allocation2 + $0x20] sm:$0xe]  ;;  %v996_v49 = vld [vmem:[#allocation2 + $0x24] sm:$0x1]  ;;  %v3033_v55 = vrot.slane %v997_v50, 9  ;;  %v1044_v59 = vrot.slane %v998_v52, 5 }
  0x65   : > { %3290 = vmatprep.subr.bf16.mxu1 %v3526_v14  ;;  %2399 = vmatmul.mubr.bf16.gmra.mxu1 %v3520_v25  ;;  %v923_v45 = vrot.slane %v922_v37, 4  ;;  %v3032_v53 = vrot.slane %v995_v48, 9  ;;  %v1040_v54 = vrot.slane %v996_v49, 5  ;;  %v1074_v60 = vld [vmem:[#allocation2 + $0x28] sm:$0xf]  ;;  %v3541_v1 = vld [vmem:[%s4658_s3 + $0x198] sm:$0xff]  }
  0x66   : > { %3331 = vmatpush3.bf16.msra.mxu0 %v3533_v42  ;;  %v937_v58 = vrot.slane %v936_v47, 4  ;;  %v1075_v61 = vld [vmem:[#allocation2 + $0x30] sm:$0xf]  ;;  %1082 = vst [vmem:[#allocation3 + $0x9c] sm:$0xf] %v1074_v60  ;;  %v1045_v0 = vsel %vm4093_vm11, %v3033_v55, %v1044_v59  ;;  %v3546_v16 = vld [vmem:[%s4658_s3 + $0x148] sm:$0xff]  }
  0x67   : > { %v928_v51 = vsel %vm4099_vm12, %v923_v45, %v927_v38  ;;  %3332 = vmatprep.subr.bf16.mxu0 %v3539_v46  ;;  %v1041_v62 = vsel %vm4093_vm11, %v3032_v53, %v1040_v54  ;;  %1083 = vst [vmem:[#allocation3 + $0xc0] sm:$0xf] %v1075_v61  ;;  %1067 = vst [vmem:[#allocation3 + $0xbc] sm:$0xf] %v1045_v0  ;;  %v3543_v4 = vld [vmem:[%s4658_s3 + $0x1d0] sm:$0xff]   ;;  %v3549_v31 = vld [vmem:[%s4658_s3 + $0x108] sm:$0xff]  }
  0x68   : > { %3291 = vmatpush3.bf16.msra.mxu1 %v3528_v20  ;;  %983 = vst [vmem:[#allocation3 + $0x94] sm:$0xf] %v928_v51  ;;  %v942_v63 = vsel %vm4099_vm12, %v937_v58, %v941_v41  ;;  %1066 = vst [vmem:[#allocation3 + $0x98] sm:$0xf] %v1041_v62  ;;  %v830_v7 = vld [vmem:[#allocation2 + $0x30] sm:$0xf] }
  0x69   : > { %3292 = vmatprep.subr.bf16.mxu1 %v3532_v39  ;;  %984 = vst [vmem:[#allocation3 + $0xb8] sm:$0xf] %v942_v63  ;;  %v831_v3 = vld [vmem:[#allocation2 + $0x38] sm:$0xf]  ;;  %838 = vst [vmem:[#allocation3 + $0xd8] sm:$0xf] %v830_v7 }
  0x6a   : > { %3333 = vmatpush3.bf16.msra.mxu0 %v3541_v1  ;;  %839 = vst [vmem:[#allocation3 + $0xfc] sm:$0xf] %v831_v3  ;;  %v852_v5 = vld [vmem:[#allocation2 + $0x30] sm:$0xf]  ;;  %v853_v8 = vld [vmem:[#allocation2 + $0x34] sm:$0x1] }
  0x6b   : > { %v854_v9 = vld [vmem:[#allocation2 + $0x38] sm:$0xf]  ;;  %3334 = vmatprep.subr.bf16.mxu0 %v3543_v4  ;;  %v855_v11 = vld [vmem:[#allocation2 + $0x3c] sm:$0x1]  ;;  %v944_v44 = vshrl.u32 %v852_v5, 16  ;;  %v947_v57 = vshll.u32 %v852_v5, 16 }
  0x6c   : > { %3293 = vmatpush3.bf16.msra.mxu1 %v3535_v43  ;;  %v953_v10 = vshll.u32 %v853_v8, 16  ;;  %v958_v12 = vshrl.u32 %v854_v9, 16  ;;  %v961_v13 = vshll.u32 %v854_v9, 16  ;;  %v967_v14 = vshll.u32 %v855_v11, 16  ;;  %v3534_v21 = vld [vmem:[#allocation3 + $0x90] ss:$36 sps:$4 sm:$0xff]  }
  0x6d   : > { %3294 = vmatprep.subr.bf16.mxu1 %v3540_v56  ;;  %v946_v17 = vrot.slane %v944_v44, 4  ;;  %v949_v18 = vrot.slane %v947_v57, 5  ;;  %v3547_v28 = vld [vmem:[%s4658_s3 + $0x190] sm:$0xff]   ;;  %v1001_v34 = vld [vmem:[#allocation2 + $0x38] sm:$0xe]  ;;  %v3553_v40 = vld [vmem:[%s4658_s3 + $0x1c8] sm:$0xff]  }
  0x6e   : > { %v955_v19 = vrot.slane %v953_v10, 5  ;;  %v960_v22 = vrot.slane %v958_v12, 4  ;;  %v3536_v23 = vld [vmem:[#allocation3 + $0x9c] ss:$36 sps:$4 sm:$0xff]   ;;  %v963_v26 = vrot.slane %v961_v13, 5  ;;  %v969_v27 = vrot.slane %v967_v14, 5  ;;  %3335 = vmatpush3.bf16.msra.mxu0 %v3547_v28 }
  0x6f   : > { %v3538_v24 = vld [vmem:[#allocation3 + $0x98] ss:$36 sps:$4 sm:$0xff]   ;;  %v950_v25 = vor.u32 %v949_v18, %v946_v17  ;;  %2471 = vmatprep.mubr.bf16.mxu0 %v3536_v23  ;;  %v999_v32 = vld [vmem:[#allocation2 + $0x30] sm:$0xe]  ;;  %v1000_v33 = vld [vmem:[#allocation2 + $0x34] sm:$0x1]  ;;  %3336 = vmatprep.subr.bf16.mxu0 %v3553_v40 }
  0x70   : > { %3295 = vmatpush3.bf16.msra.mxu1 %v3542_v2  ;;  %v3530_v20 = vld [vmem:[#allocation3 + $0x94] ss:$36 sps:$4 sm:$0xff]   ;;  %v964_v30 = vor.u32 %v963_v26, %v960_v22  ;;  %2472 = vmatmul.mubr.bf16.gmra.mxu0 %v3538_v24  ;;  %v1002_v37 = vld [vmem:[#allocation2 + $0x3c] sm:$0x1]  ;;  %v3034_v38 = vrot.slane %v999_v32, 9  ;;  %v1048_v39 = vrot.slane %v1000_v33, 5 }
  0x71   : > { %3296 = vmatprep.subr.bf16.mxu1 %v3546_v16  ;;  %2406 = vmatprep.mubr.bf16.mxu1 %v3530_v20  ;;  %v951_v29 = vrot.slane %v950_v25, 4  ;;  %v3035_v41 = vrot.slane %v1001_v34, 9  ;;  %v1052_v42 = vrot.slane %v1002_v37, 5  ;;  %v1076_v43 = vld [vmem:[#allocation2 + $0x38] sm:$0xf]  ;;  %v3554_v49 = vld [vmem:[%s4658_s3 + $0x140] sm:$0xff]  }
  0x72   : > { %2407 = vmatmul.mubr.bf16.gmra.mxu1 %v3534_v21  ;;  %v965_v36 = vrot.slane %v964_v30, 4  ;;  %v1077_v45 = vld [vmem:[#allocation2 + $0x40] sm:$0xf]  ;;  %v1049_v47 = vsel %vm4093_vm11, %v3034_v38, %v1048_v39  ;;  %1084 = vst [vmem:[#allocation3 + $0xe4] sm:$0xf] %v1076_v43  ;;  %v3555_v50 = vld [vmem:[%s4658_s3 + $0x188] sm:$0xff]  }
  0x73   : > { %v956_v35 = vsel %vm4099_vm12, %v951_v29, %v955_v19  ;;  %1085 = vst [vmem:[#allocation3 + $0x108] sm:$0xf] %v1077_v45  ;;  %v1053_v48 = vsel %vm4093_vm11, %v3035_v41, %v1052_v42  ;;  %1068 = vst [vmem:[#allocation3 + $0xe0] sm:$0xf] %v1049_v47  ;;  %v3556_v51 = vld [vmem:[%s4658_s3 + $0x100] sm:$0xff]   ;;  %3337 = vmatpush3.bf16.msra.mxu0 %v3555_v50  ;;  %v4228_v18 = vld [vmem:[%s4658_s3 + $0x238] sm:$0xff]  }
  0x74   : > { %3297 = vmatpush3.bf16.msra.mxu1 %v3549_v31  ;;  %985 = vst [vmem:[#allocation3 + $0xdc] sm:$0xf] %v956_v35  ;;  %v970_v46 = vsel %vm4099_vm12, %v965_v36, %v969_v27  ;;  %1069 = vst [vmem:[#allocation3 + $0x104] sm:$0xf] %v1053_v48  ;;  %v3557_v52 = vld [vmem:[%s4658_s3 + $0x1c0] sm:$0xff]  }
  0x75   : > { %986 = vst [vmem:[#allocation3 + $0x100] sm:$0xf] %v970_v46  ;;  %3298 = vmatprep.subr.bf16.mxu1 %v3554_v49  ;;  %v1086_v53 = vld [vmem:[#allocation2 + $0x8] sm:$0xf]  ;;  %v1087_v54 = vld [vmem:[#allocation2 + $0xc] sm:$0x1]  ;;  %3338 = vmatprep.subr.bf16.mxu0 %v3557_v52 }
  0x76   : > { %v1088_v55 = vld [vmem:[#allocation2 + $0x10] sm:$0xf]  ;;  %v1089_v56 = vld [vmem:[#allocation2 + $0x14] sm:$0x1]  ;;  %v1103_v58 = vshrl.u32 %v1086_v53, 16  ;;  %v1106_v59 = vshll.u32 %v1086_v53, 16 }
  0x77   : > { %v1112_v60 = vshll.u32 %v1087_v54, 16  ;;  %v1117_v61 = vshrl.u32 %v1088_v55, 16  ;;  %v3561_v62 = vld [vmem:[%s4658_s3 + $0x180] sm:$0xff]   ;;  %v1120_v63 = vshll.u32 %v1088_v55, 16  ;;  %v1126_v0 = vshll.u32 %v1089_v56, 16 }
  0x78   : > { %3299 = vmatpush3.bf16.msra.mxu1 %v3556_v51  ;;  %v1230_v1 = vld [vmem:[#allocation2 + $0x8] sm:$0xe]  ;;  %v1231_v2 = vld [vmem:[#allocation2 + $0xc] sm:$0x1]  ;;  %v1105_v3 = vrot.slane %v1103_v58, 4  ;;  %3339 = vmatpush3.bf16.msra.mxu0 %v3561_v62  ;;  %v1108_v8 = vrot.slane %v1106_v59, 5 }
  0x79   : > { %v3548_v7 = vld [vmem:[#allocation3 + $0xd8] ss:$36 sps:$4 sm:$0xff]   ;;  %v1114_v9 = vrot.slane %v1112_v60, 5  ;;  %v1119_v44 = vrot.slane %v1117_v61, 4  ;;  %v1122_v57 = vrot.slane %v1120_v63, 5  ;;  %v1128_v10 = vrot.slane %v1126_v0, 5  ;;  %3388 = vmatprep.subr.bf16.mxu1 %v4228_v18 }
  0x7a   : > { %v3550_v5 = vld [vmem:[#allocation3 + $0xe4] ss:$36 sps:$4 sm:$0xff]   ;;  %v3036_v12 = vrot.slane %v1230_v1, 9  ;;  %v1109_v13 = vor.u32 %v1108_v8, %v1105_v3  ;;  %v1232_v14 = vld [vmem:[#allocation2 + $0x10] sm:$0xe]  ;;  %v1264_v17 = vrot.slane %v1231_v2, 5 }
  0x7b   : > { %v3552_v11 = vld [vmem:[#allocation3 + $0xe0] ss:$36 sps:$4 sm:$0xff]   ;;  %2479 = vmatprep.mubr.bf16.mxu0 %v3550_v5  ;;  %v1123_v19 = vor.u32 %v1122_v57, %v1119_v44  ;;  %v3037_v20 = vrot.slane %v1232_v14, 9  ;;  %v1312_v27 = vld [vmem:[#allocation2 + $0x18] sm:$0xf] }
  0x7c   : > { %v3544_v4 = vld [vmem:[#allocation3 + $0xdc] ss:$36 sps:$4 sm:$0xff]   ;;  %v1233_v16 = vld [vmem:[#allocation2 + $0x14] sm:$0x1]  ;;  %2480 = vmatmul.mubr.bf16.gmra.mxu0 %v3552_v11  ;;  %v1110_v22 = vrot.slane %v1109_v13, 4  ;;  %v1265_v23 = vsel %vm4093_vm11, %v3036_v12, %v1264_v17 }
  0x7d   : > { %2414 = vmatprep.mubr.bf16.mxu1 %v3544_v4  ;;  %v1268_v21 = vrot.slane %v1233_v16, 5  ;;  %v1124_v24 = vrot.slane %v1123_v19, 4  ;;  %1302 = vst [vmem:[#allocation3 + $0x14] sm:$0xf] %v1265_v23  ;;  %v1311_v26 = vld [vmem:[#allocation2 + $0x10] sm:$0xf] }
  0x7e   : > { %2415 = vmatmul.mubr.bf16.gmra.mxu1 %v3548_v7  ;;  %v1115_v28 = vsel %vm4099_vm12, %v1110_v22, %v1114_v9  ;;  %1319 = vst [vmem:[#allocation3 + $0x18] sm:$0xf] %v1311_v26  ;;  %1320 = vst [vmem:[#allocation3 + $0x3c] sm:$0xf] %v1312_v27  ;;  %v1327_v29 = vld [vmem:[#allocation2 + $0x10] sm:$0xf] }
  0x7f   : > { %v1269_v25 = vsel %vm4093_vm11, %v3037_v20, %v1268_v21  ;;  %v1328_v30 = vld [vmem:[#allocation2 + $0x14] sm:$0x1]  ;;  %v1329_v31 = vld [vmem:[#allocation2 + $0x18] sm:$0xf]  ;;  %v1129_v32 = vsel %vm4099_vm12, %v1124_v24, %v1128_v10  ;;  %1222 = vst [vmem:[#allocation3 + $0x10] sm:$0xf] %v1115_v28 }
  0x80   : > { %1303 = vst [vmem:[#allocation3 + $0x38] sm:$0xf] %v1269_v25  ;;  %v1330_v33 = vld [vmem:[#allocation2 + $0x1c] sm:$0x1]  ;;  %v1344_v34 = vshrl.u32 %v1327_v29, 16  ;;  %v1347_v35 = vshll.u32 %v1327_v29, 16 }
  0x81   : > { %v1353_v36 = vshll.u32 %v1328_v30, 16  ;;  %1223 = vst [vmem:[#allocation3 + $0x34] sm:$0xf] %v1129_v32  ;;  %v1358_v37 = vshrl.u32 %v1329_v31, 16  ;;  %v1361_v38 = vshll.u32 %v1329_v31, 16  ;;  %v1367_v39 = vshll.u32 %v1330_v33, 16 }
  0x82   : > { %v1346_v40 = vrot.slane %v1344_v34, 4  ;;  %v1349_v41 = vrot.slane %v1347_v35, 5  ;;  %v1090_v47 = vld [vmem:[#allocation2 + $0x18] sm:$0xf]  ;;  %v1091_v49 = vld [vmem:[#allocation2 + $0x1c] sm:$0x1] }
  0x83   : > { %v1355_v42 = vrot.slane %v1353_v36, 5  ;;  %v1360_v43 = vrot.slane %v1358_v37, 4  ;;  %v1363_v45 = vrot.slane %v1361_v38, 5  ;;  %v1369_v46 = vrot.slane %v1367_v39, 5  ;;  %v1092_v50 = vld [vmem:[#allocation2 + $0x20] sm:$0xf] }
  0x84   : > { %v1350_v48 = vor.u32 %v1349_v41, %v1346_v40  ;;  %v1093_v51 = vld [vmem:[#allocation2 + $0x24] sm:$0x1]  ;;  %v1131_v53 = vshrl.u32 %v1090_v47, 16  ;;  %v1134_v54 = vshll.u32 %v1090_v47, 16  ;;  %v1140_v55 = vshll.u32 %v1091_v49, 16  ;;  %v3566_v63 = vld [vmem:[%s4658_s3 + $0x230] sm:$0xff]  }
  0x85   : > { %v1364_v52 = vor.u32 %v1363_v45, %v1360_v43  ;;  %v1145_v58 = vshrl.u32 %v1092_v50, 16  ;;  %v1148_v59 = vshll.u32 %v1092_v50, 16  ;;  %v1154_v60 = vshll.u32 %v1093_v51, 16  ;;  %v1234_v61 = vld [vmem:[#allocation2 + $0x18] sm:$0xe]  ;;  %v3569_v21 = vld [vmem:[%s4658_s3 + $0x228] sm:$0xff]  }
  0x86   : > { %v1351_v56 = vrot.slane %v1350_v48, 4  ;;  %v1133_v0 = vrot.slane %v1131_v53, 4  ;;  %v1136_v1 = vrot.slane %v1134_v54, 5  ;;  %v1235_v2 = vld [vmem:[#allocation2 + $0x1c] sm:$0x1]  ;;  %v1142_v11 = vrot.slane %v1140_v55, 5 }
  0x87   : > { %v1365_v62 = vrot.slane %v1364_v52, 4  ;;  %v3560_v7 = vld [vmem:[#allocation3 + $0x14] ss:$36 sps:$4 sm:$0xff]   ;;  %v1147_v5 = vrot.slane %v1145_v58, 4  ;;  %v1150_v44 = vrot.slane %v1148_v59, 5  ;;  %v3038_v12 = vrot.slane %v1234_v61, 9 }
  0x88   : > { %v3558_v4 = vld [vmem:[#allocation3 + $0x10] ss:$36 sps:$4 sm:$0xff]   ;;  %v1356_v3 = vsel %vm4099_vm12, %v1351_v56, %v1355_v42  ;;  %v1137_v9 = vor.u32 %v1136_v1, %v1133_v0  ;;  %2520 = vmatprep.mubr.bf16.mxu1 %v3560_v7  ;;  %v1272_v13 = vrot.slane %v1235_v2, 5  ;;  %v1156_v20 = vrot.slane %v1154_v60, 5  ;;  %v1314_v25 = vld [vmem:[#allocation2 + $0x28] sm:$0xf] }
  0x89   : > { %v1370_v8 = vsel %vm4099_vm12, %v1365_v62, %v1369_v46  ;;  %1463 = vst [vmem:[#allocation3 + $0x1c] sm:$0xf] %v1356_v3  ;;  %v1236_v57 = vld [vmem:[#allocation2 + $0x20] sm:$0xe]  ;;  %v1237_v10 = vld [vmem:[#allocation2 + $0x24] sm:$0x1]  ;;  %2521 = vmatmul.mubr.bf16.vlgmr.msra.gmra.mxu1 %v3558_v4  ;;  %v1151_v19 = vor.u32 %v1150_v44, %v1147_v5 }
  0x8a   : > { %1464 = vst [vmem:[#allocation3 + $0x40] sm:$0xf] %v1370_v8  ;;  %v3039_v14 = vrot.slane %v1236_v57, 9  ;;  %v1276_v16 = vrot.slane %v1237_v10, 5  ;;  %v1138_v17 = vrot.slane %v1137_v9, 4  ;;  %3389 = vmatpush3.bf16.msra.mxu1 %v4228_v18  ;;  %v1273_v23 = vsel %vm4093_vm11, %v3038_v12, %v1272_v13  ;;  %v3574_v45 = vld [vmem:[%s4658_s3 + $0x220] sm:$0xff]  }
  0x8b   : > { %v1313_v22 = vld [vmem:[#allocation2 + $0x20] sm:$0xf]  ;;  %v1332_v27 = vld [vmem:[#allocation2 + $0x24] sm:$0x1]  ;;  %3390 = vmatprep.subr.bf16.mxu1 %v3566_v63  ;;  %v1152_v29 = vrot.slane %v1151_v19, 4  ;;  %v3577_v3 = vld [vmem:[%s4658_s3 + $0x218] sm:$0xff]  }
  0x8c   : > { %v1277_v24 = vsel %vm4093_vm11, %v3039_v14, %v1276_v16  ;;  %1321 = vst [vmem:[#allocation3 + $0x60] sm:$0xf] %v1313_v22  ;;  %v1331_v26 = vld [vmem:[#allocation2 + $0x20] sm:$0xf]  ;;  %v1143_v28 = vsel %vm4099_vm12, %v1138_v17, %v1142_v11  ;;  %1304 = vst [vmem:[#allocation3 + $0x5c] sm:$0xf] %v1273_v23 }
  0x8d   : > { %1305 = vst [vmem:[#allocation3 + $0x80] sm:$0xf] %v1277_v24  ;;  %1322 = vst [vmem:[#allocation3 + $0x84] sm:$0xf] %v1314_v25  ;;  %v1333_v30 = vld [vmem:[#allocation2 + $0x28] sm:$0xf]  ;;  %v1157_v36 = vsel %vm4099_vm12, %v1152_v29, %v1156_v20 }
  0x8e   : > { %v1334_v18 = vld [vmem:[#allocation2 + $0x2c] sm:$0x1]  ;;  %v1372_v31 = vshrl.u32 %v1331_v26, 16  ;;  %1224 = vst [vmem:[#allocation3 + $0x58] sm:$0xf] %v1143_v28  ;;  %v1375_v32 = vshll.u32 %v1331_v26, 16  ;;  %3391 = vmatpush3.bf16.msra.mxu1 %v3566_v63 }
  0x8f   : > { %v1381_v33 = vshll.u32 %v1332_v27, 16  ;;  %v1386_v34 = vshrl.u32 %v1333_v30, 16  ;;  %v1389_v35 = vshll.u32 %v1333_v30, 16  ;;  %v1395_v38 = vshll.u32 %v1334_v18, 16  ;;  %v1094_v39 = vld [vmem:[#allocation2 + $0x28] sm:$0xf]  ;;  %3392 = vmatprep.subr.bf16.mxu1 %v3569_v21 }
  0x90   : > { %v1374_v37 = vrot.slane %v1372_v31, 4  ;;  %1225 = vst [vmem:[#allocation3 + $0x7c] sm:$0xf] %v1157_v36  ;;  %v1377_v40 = vrot.slane %v1375_v32, 5  ;;  %v3563_v46 = vld [vmem:[#allocation3 + $0x18] ss:$36 sps:$4 sm:$0xff]  }
  0x91   : > { %v1383_v41 = vrot.slane %v1381_v33, 5  ;;  %v1388_v42 = vrot.slane %v1386_v34, 4  ;;  %v1391_v43 = vrot.slane %v1389_v35, 5  ;;  %v3565_v47 = vld [vmem:[#allocation3 + $0x1c] ss:$36 sps:$4 sm:$0xff]   ;;  %v1397_v48 = vrot.slane %v1395_v38, 5 }
  0x92   : > { %v1378_v49 = vor.u32 %v1377_v40, %v1374_v37  ;;  %v1095_v51 = vld [vmem:[#allocation2 + $0x2c] sm:$0x1]  ;;  %v1096_v52 = vld [vmem:[#allocation2 + $0x30] sm:$0xf]  ;;  %v1097_v53 = vld [vmem:[#allocation2 + $0x34] sm:$0x1]  ;;  %2585 = vmatprep.mubr.bf16.mxu0 %v3565_v47  ;;  %3393 = vmatpush3.bf16.msra.mxu1 %v3569_v21 }
  0x93   : > { %v1392_v50 = vor.u32 %v1391_v43, %v1388_v42  ;;  %v1159_v54 = vshrl.u32 %v1094_v39, 16  ;;  %v1162_v55 = vshll.u32 %v1094_v39, 16  ;;  %v1168_v56 = vshll.u32 %v1095_v51, 16  ;;  %v1238_v59 = vld [vmem:[#allocation2 + $0x28] sm:$0xe]  ;;  %2586 = vmatmul.mubr.bf16.vlgmr.msra.gmra.mxu0 %v3563_v46  ;;  %3394 = vmatprep.subr.bf16.mxu1 %v3574_v45  ;;  %v3582_v23 = vld [vmem:[%s4658_s3 + $0x210] sm:$0xff]  }
  0x94   : > { %v1173_v58 = vshrl.u32 %v1096_v52, 16  ;;  %v1379_v60 = vrot.slane %v1378_v49, 4  ;;  %v1176_v62 = vshll.u32 %v1096_v52, 16  ;;  %v1182_v63 = vshll.u32 %v1097_v53, 16  ;;  %v1239_v0 = vld [vmem:[#allocation2 + $0x2c] sm:$0x1] }
  0x95   : > { %v1393_v61 = vrot.slane %v1392_v50, 4  ;;  %v1161_v1 = vrot.slane %v1159_v54, 4  ;;  %v1164_v2 = vrot.slane %v1162_v55, 5  ;;  %v1170_v4 = vrot.slane %v1168_v56, 5  ;;  %v1240_v44 = vld [vmem:[#allocation2 + $0x30] sm:$0xe] }
  0x96   : > { %v1175_v7 = vrot.slane %v1173_v58, 4  ;;  %v1384_v5 = vsel %vm4099_vm12, %v1379_v60, %v1383_v41  ;;  %v1178_v9 = vrot.slane %v1176_v62, 5  ;;  %v1184_v11 = vrot.slane %v1182_v63, 5  ;;  %v1241_v57 = vld [vmem:[#allocation2 + $0x34] sm:$0x1]  ;;  %3395 = vmatpush3.bf16.msra.mxu1 %v3574_v45  ;;  %v3585_v39 = vld [vmem:[%s4658_s3 + $0x208] sm:$0xff]  }
  0x97   : > { %v1398_v8 = vsel %vm4099_vm12, %v1393_v61, %v1397_v48  ;;  %v3567_v10 = vld [vmem:[#allocation3 + $0x5c] ss:$36 sps:$4 sm:$0xff]   ;;  %1465 = vst [vmem:[#allocation3 + $0x64] sm:$0xf] %v1384_v5  ;;  %v1165_v13 = vor.u32 %v1164_v2, %v1161_v1  ;;  %v3040_v14 = vrot.slane %v1238_v59, 9  ;;  %v1280_v17 = vrot.slane %v1239_v0, 5  ;;  %3396 = vmatprep.subr.bf16.mxu1 %v3577_v3 }
  0x98   : > { %v3570_v12 = vld [vmem:[#allocation3 + $0x58] ss:$36 sps:$4 sm:$0xff]   ;;  %1466 = vst [vmem:[#allocation3 + $0x88] sm:$0xf] %v1398_v8  ;;  %v1179_v16 = vor.u32 %v1178_v9, %v1175_v7  ;;  %v3041_v19 = vrot.slane %v1240_v44, 9  ;;  %v1284_v20 = vrot.slane %v1241_v57, 5  ;;  %2528 = vmatprep.mubr.bf16.mxu1 %v3567_v10 }
  0x99   : > { %v1166_v21 = vrot.slane %v1165_v13, 4  ;;  %v1315_v22 = vld [vmem:[#allocation2 + $0x30] sm:$0xf]  ;;  %2529 = vmatmul.mubr.bf16.gmra.mxu1 %v3570_v12  ;;  %v1281_v25 = vsel %vm4093_vm11, %v3040_v14, %v1280_v17  ;;  %v1316_v27 = vld [vmem:[#allocation2 + $0x38] sm:$0xf]  ;;  %v3590_v59 = vld [vmem:[%s4658_s3 + $0x200] sm:$0xff]  }
  0x9a   : > { %v1180_v24 = vrot.slane %v1179_v16, 4  ;;  %v1285_v26 = vsel %vm4093_vm11, %v3041_v19, %v1284_v20  ;;  %1323 = vst [vmem:[#allocation3 + $0xa8] sm:$0xf] %v1315_v22  ;;  %v1335_v28 = vld [vmem:[#allocation2 + $0x30] sm:$0xf]  ;;  %3397 = vmatpush3.bf16.msra.mxu1 %v3577_v3 }
  0x9b   : > { %v1171_v29 = vsel %vm4099_vm12, %v1166_v21, %v1170_v4  ;;  %1306 = vst [vmem:[#allocation3 + $0xa4] sm:$0xf] %v1281_v25  ;;  %1307 = vst [vmem:[#allocation3 + $0xc8] sm:$0xf] %v1285_v26  ;;  %v1336_v30 = vld [vmem:[#allocation2 + $0x34] sm:$0x1]  ;;  %3398 = vmatprep.subr.bf16.mxu1 %v3582_v23 }
  0x9c   : > { %1324 = vst [vmem:[#allocation3 + $0xcc] sm:$0xf] %v1316_v27  ;;  %v1337_v18 = vld [vmem:[#allocation2 + $0x38] sm:$0xf]  ;;  %v1338_v31 = vld [vmem:[#allocation2 + $0x3c] sm:$0x1]  ;;  %v1185_v32 = vsel %vm4099_vm12, %v1180_v24, %v1184_v11 }
  0x9d   : > { %1226 = vst [vmem:[#allocation3 + $0xa0] sm:$0xf] %v1171_v29  ;;  %v1400_v33 = vshrl.u32 %v1335_v28, 16  ;;  %v1403_v34 = vshll.u32 %v1335_v28, 16  ;;  %v1409_v35 = vshll.u32 %v1336_v30, 16  ;;  %v1414_v36 = vshrl.u32 %v1337_v18, 16 }
  0x9e   : > { %1227 = vst [vmem:[#allocation3 + $0xc4] sm:$0xf] %v1185_v32  ;;  %v1417_v37 = vshll.u32 %v1337_v18, 16  ;;  %v1423_v38 = vshll.u32 %v1338_v31, 16  ;;  %v3573_v43 = vld [vmem:[#allocation3 + $0x60] ss:$36 sps:$4 sm:$0xff]   ;;  %3399 = vmatpush3.bf16.msra.mxu1 %v3582_v23 }
  0x9f   : > { %v3571_v40 = vld [vmem:[#allocation3 + $0x64] ss:$36 sps:$4 sm:$0xff]   ;;  %v1402_v41 = vrot.slane %v1400_v33, 4  ;;  %v1405_v42 = vrot.slane %v1403_v34, 5  ;;  %v1411_v45 = vrot.slane %v1409_v35, 5  ;;  %v1416_v46 = vrot.slane %v1414_v36, 4  ;;  %3400 = vmatprep.subr.bf16.mxu1 %v3585_v39 }
  0xa0   : > { %v1419_v47 = vrot.slane %v1417_v37, 5  ;;  %v1425_v48 = vrot.slane %v1423_v38, 5  ;;  %2593 = vmatprep.mubr.bf16.mxu0 %v3571_v40  ;;  %v1098_v50 = vld [vmem:[#allocation2 + $0x38] sm:$0xf]  ;;  %v1099_v51 = vld [vmem:[#allocation2 + $0x3c] sm:$0x1] }
  0xa1   : > { %v1406_v49 = vor.u32 %v1405_v42, %v1402_v41  ;;  %v1100_v52 = vld [vmem:[#allocation2 + $0x40] sm:$0xf]  ;;  %2594 = vmatmul.mubr.bf16.gmra.mxu0 %v3573_v43  ;;  %v1101_v54 = vld [vmem:[#allocation2 + $0x44] sm:$0x1]  ;;  %v1187_v55 = vshrl.u32 %v1098_v50, 16  ;;  %v1190_v56 = vshll.u32 %v1098_v50, 16 }
  0xa2   : > { %v1420_v53 = vor.u32 %v1419_v47, %v1416_v46  ;;  %v1196_v58 = vshll.u32 %v1099_v51, 16  ;;  %v1201_v61 = vshrl.u32 %v1100_v52, 16  ;;  %v1204_v62 = vshll.u32 %v1100_v52, 16  ;;  %v1242_v4 = vld [vmem:[#allocation2 + $0x38] sm:$0xe]  ;;  %3401 = vmatpush3.bf16.msra.mxu1 %v3585_v39 }
  0xa3   : > { %v1407_v60 = vrot.slane %v1406_v49, 4  ;;  %v1210_v63 = vshll.u32 %v1101_v54, 16  ;;  %v1189_v1 = vrot.slane %v1187_v55, 4  ;;  %v1192_v2 = vrot.slane %v1190_v56, 5  ;;  %v3575_v7 = vld [vmem:[#allocation3 + $0xa4] ss:$36 sps:$4 sm:$0xff]   ;;  %3402 = vmatprep.subr.bf16.mxu1 %v3590_v59 }
  0xa4   : > { %v1421_v0 = vrot.slane %v1420_v53, 4  ;;  %v1203_v8 = vrot.slane %v1201_v61, 4  ;;  %v1198_v44 = vrot.slane %v1196_v58, 5  ;;  %v1206_v57 = vrot.slane %v1204_v62, 5  ;;  %v1243_v10 = vld [vmem:[#allocation2 + $0x3c] sm:$0x1]  ;;  %2536 = vmatprep.mubr.bf16.mxu1 %v3575_v7 }
  0xa5   : > { %v3578_v3 = vld [vmem:[#allocation3 + $0xa0] ss:$36 sps:$4 sm:$0xff]   ;;  %v1412_v5 = vsel %vm4099_vm12, %v1407_v60, %v1411_v45  ;;  %v1193_v11 = vor.u32 %v1192_v2, %v1189_v1  ;;  %v1244_v12 = vld [vmem:[#allocation2 + $0x40] sm:$0xe]  ;;  %v1212_v13 = vrot.slane %v1210_v63, 5  ;;  %v3042_v16 = vrot.slane %v1242_v4, 9 }
  0xa6   : > { %v1426_v9 = vsel %vm4099_vm12, %v1421_v0, %v1425_v48  ;;  %1467 = vst [vmem:[#allocation3 + $0xac] sm:$0xf] %v1412_v5  ;;  %v1245_v14 = vld [vmem:[#allocation2 + $0x44] sm:$0x1]  ;;  %v1288_v17 = vrot.slane %v1243_v10, 5  ;;  %v3043_v19 = vrot.slane %v1244_v12, 9  ;;  %2537 = vmatmul.mubr.bf16.gmra.mxu1 %v3578_v3  ;;  %v1207_v21 = vor.u32 %v1206_v57, %v1203_v8 }
  0xa7   : > { %1468 = vst [vmem:[#allocation3 + $0xd0] sm:$0xf] %v1426_v9  ;;  %v1194_v20 = vrot.slane %v1193_v11, 4  ;;  %v1292_v22 = vrot.slane %v1245_v14, 5  ;;  %v1317_v24 = vld [vmem:[#allocation2 + $0x40] sm:$0xf]  ;;  %3403 = vmatpush3.bf16.msra.mxu1 %v3590_v59 }
  0xa8   : > { %v1289_v23 = vsel %vm4093_vm11, %v3042_v16, %v1288_v17  ;;  %v1318_v25 = vld [vmem:[#allocation2 + $0x48] sm:$0xf]  ;;  %v1339_v26 = vld [vmem:[#allocation2 + $0x40] sm:$0xf]  ;;  %v1208_v28 = vrot.slane %v1207_v21, 4 }
  0xa9   : > { %v1199_v27 = vsel %vm4099_vm12, %v1194_v20, %v1198_v44  ;;  %v1293_v29 = vsel %vm4093_vm11, %v3043_v19, %v1292_v22  ;;  %1308 = vst [vmem:[#allocation3 + $0xec] sm:$0xf] %v1289_v23  ;;  %1325 = vst [vmem:[#allocation3 + $0xf0] sm:$0xf] %v1317_v24  ;;  %v1340_v30 = vld [vmem:[#allocation2 + $0x44] sm:$0x1] }
  0xaa   : > { %1326 = vst [vmem:[#allocation3 + $0x114] sm:$0xf] %v1318_v25  ;;  %v1341_v18 = vld [vmem:[#allocation2 + $0x48] sm:$0xf]  ;;  %v1428_v31 = vshrl.u32 %v1339_v26, 16  ;;  %v1431_v33 = vshll.u32 %v1339_v26, 16  ;;  %v1213_v37 = vsel %vm4099_vm12, %v1208_v28, %v1212_v13 }
  0xab   : > { %1228 = vst [vmem:[#allocation3 + $0xe8] sm:$0xf] %v1199_v27  ;;  %1309 = vst [vmem:[#allocation3 + $0x110] sm:$0xf] %v1293_v29  ;;  %v1342_v32 = vld [vmem:[#allocation2 + $0x4c] sm:$0x1] }
  0xac   : > { %v1437_v34 = vshll.u32 %v1340_v30, 16  ;;  %v1442_v35 = vshrl.u32 %v1341_v18, 16  ;;  %v1445_v36 = vshll.u32 %v1341_v18, 16  ;;  %v1430_v38 = vrot.slane %v1428_v31, 4  ;;  %1229 = vst [vmem:[#allocation3 + $0x10c] sm:$0xf] %v1213_v37 }
  0xad   : > { %v1451_v39 = vshll.u32 %v1342_v32, 16  ;;  %v1433_v40 = vrot.slane %v1431_v33, 5  ;;  %v3581_v46 = vld [vmem:[#allocation3 + $0xa8] ss:$36 sps:$4 sm:$0xff]   ;;  %v1471_v50 = vld [vmem:[#allocation2 + $0x10] sm:$0xe] }
  0xae   : > { %v1439_v41 = vrot.slane %v1437_v34, 5  ;;  %v1444_v42 = vrot.slane %v1442_v35, 4  ;;  %v1447_v43 = vrot.slane %v1445_v36, 5  ;;  %v3579_v45 = vld [vmem:[#allocation3 + $0xac] ss:$36 sps:$4 sm:$0xff]   ;;  %v3044_v54 = vrot.slane %v1471_v50, 9 }
  0xaf   : > { %v1453_v47 = vrot.slane %v1451_v39, 5  ;;  %v1434_v48 = vor.u32 %v1433_v40, %v1430_v38  ;;  %v1472_v51 = vld [vmem:[#allocation2 + $0x14] sm:$0x1]  ;;  %v1473_v52 = vld [vmem:[#allocation2 + $0x18] sm:$0xe]  ;;  %2601 = vmatprep.mubr.bf16.mxu0 %v3579_v45 }
  0xb0   : > { %v1448_v49 = vor.u32 %v1447_v43, %v1444_v42  ;;  %v1474_v53 = vld [vmem:[#allocation2 + $0x1c] sm:$0x1]  ;;  %v1505_v55 = vrot.slane %v1472_v51, 5  ;;  %v3045_v56 = vrot.slane %v1473_v52, 9  ;;  %2602 = vmatmul.mubr.bf16.gmra.mxu0 %v3581_v46  ;;  %v1475_v61 = vld [vmem:[#allocation2 + $0x20] sm:$0xe] }
  0xb1   : > { %v1435_v58 = vrot.slane %v1434_v48, 4  ;;  %v1509_v60 = vrot.slane %v1474_v53, 5  ;;  %v1476_v63 = vld [vmem:[#allocation2 + $0x24] sm:$0x1]  ;;  %v1477_v0 = vld [vmem:[#allocation2 + $0x28] sm:$0xe] }
  0xb2   : > { %v1449_v59 = vrot.slane %v1448_v49, 4  ;;  %v1506_v62 = vsel %vm4093_vm11, %v3044_v54, %v1505_v55  ;;  %v3046_v1 = vrot.slane %v1475_v61, 9  ;;  %v1478_v3 = vld [vmem:[#allocation2 + $0x2c] sm:$0x1]  ;;  %v1513_v5 = vrot.slane %v1476_v63, 5 }
  0xb3   : > { %v1440_v2 = vsel %vm4099_vm12, %v1435_v58, %v1439_v41  ;;  %v1510_v7 = vsel %vm4093_vm11, %v3045_v56, %v1509_v60  ;;  %1543 = vst [vmem:[#allocation3 + $0x20] sm:$0xf] %v1506_v62  ;;  %v1479_v8 = vld [vmem:[#allocation2 + $0x30] sm:$0xe]  ;;  %v3583_v9 = vld [vmem:[#allocation3 + $0xec] ss:$36 sps:$4 sm:$0xff]  }
  0xb4   : > { %v1454_v4 = vsel %vm4099_vm12, %v1449_v59, %v1453_v47  ;;  %v3586_v11 = vld [vmem:[#allocation3 + $0xe8] ss:$36 sps:$4 sm:$0xff]   ;;  %1469 = vst [vmem:[#allocation3 + $0xf4] sm:$0xf] %v1440_v2  ;;  %1544 = vst [vmem:[#allocation3 + $0x44] sm:$0xf] %v1510_v7  ;;  %v1514_v57 = vsel %vm4093_vm11, %v3046_v1, %v1513_v5  ;;  %2544 = vmatprep.mubr.bf16.mxu1 %v3583_v9 }
  0xb5   : > { %1470 = vst [vmem:[#allocation3 + $0x118] sm:$0xf] %v1454_v4  ;;  %v3047_v44 = vrot.slane %v1477_v0, 9  ;;  %v1517_v10 = vrot.slane %v1478_v3, 5  ;;  %v1480_v12 = vld [vmem:[#allocation2 + $0x34] sm:$0x1]  ;;  %2545 = vmatmul.mubr.bf16.gmra.mxu1 %v3586_v11 }
  0xb6   : > { %v1481_v15 = vld [vmem:[#allocation2 + $0x38] sm:$0xe]  ;;  %v3048_v13 = vrot.slane %v1479_v8, 9  ;;  %1545 = vst [vmem:[#allocation3 + $0x68] sm:$0xf] %v1514_v57  ;;  %v1521_v16 = vrot.slane %v1480_v12, 5 }
  0xb7   : > { %v1482_v14 = vld [vmem:[#allocation2 + $0x3c] sm:$0x1]  ;;  %v3049_v17 = vrot.slane %v1481_v15, 9  ;;  %v1483_v19 = vld [vmem:[#allocation2 + $0x40] sm:$0xe]  ;;  %v1518_v20 = vsel %vm4093_vm11, %v3047_v44, %v1517_v10 }
  0xb8   : > { %v1525_v21 = vrot.slane %v1482_v14, 5  ;;  %v1484_v22 = vld [vmem:[#allocation2 + $0x44] sm:$0x1]  ;;  %v1485_v23 = vld [vmem:[#allocation2 + $0x48] sm:$0xe]  ;;  %v3050_v24 = vrot.slane %v1483_v19, 9  ;;  %v1522_v25 = vsel %vm4093_vm11, %v3048_v13, %v1521_v16 }
  0xb9   : > { %1546 = vst [vmem:[#allocation3 + $0x8c] sm:$0xf] %v1518_v20  ;;  %v1486_v26 = vld [vmem:[#allocation2 + $0x4c] sm:$0x1]  ;;  %v1529_v27 = vrot.slane %v1484_v22, 5  ;;  %v3051_v28 = vrot.slane %v1485_v23, 9 }
  0xba   : > { %v1526_v29 = vsel %vm4093_vm11, %v3049_v17, %v1525_v21  ;;  %1547 = vst [vmem:[#allocation3 + $0xb0] sm:$0xf] %v1522_v25  ;;  %v1533_v30 = vrot.slane %v1486_v26, 5  ;;  %v3589_v33 = vld [vmem:[#allocation3 + $0xf0] ss:$36 sps:$4 sm:$0xff]  }
  0xbb   : > { %1548 = vst [vmem:[#allocation3 + $0xd4] sm:$0xf] %v1526_v29  ;;  %v1530_v18 = vsel %vm4093_vm11, %v3050_v24, %v1529_v27  ;;  %v3591_v34 = vld [vmem:[#allocation3 + $0x20] ss:$36 sps:$4 sm:$0xff]   ;;  %v3011_v6 = vld [vmem:[%s4640_s8] ss:$0 sm:$0xff] }
  0xbc   : > { %v3587_v31 = vld [vmem:[#allocation3 + $0xf4] ss:$36 sps:$4 sm:$0xff]   ;;  %v1534_v32 = vsel %vm4093_vm11, %v3051_v28, %v1533_v30  ;;  %1549 = vst [vmem:[#allocation3 + $0xf8] sm:$0xf] %v1530_v18  ;;  %3404 = vmatprep.mubr.bf16.mxu1 %v3591_v34 }
  0xbd   : > { %1550 = vst [vmem:[#allocation3 + $0x11c] sm:$0xf] %v1534_v32  ;;  %2609 = vmatprep.mubr.bf16.mxu0 %v3587_v31 }
  0xbe   : > { %2610 = vmatmul.mubr.bf16.gmra.mxu0 %v3589_v33 }
  0xc0   : > { %v3592_v35 = vld [vmem:[#allocation3 + $0x68] ss:$36 sps:$4 sm:$0xff]  }
  0xc1   : > { %3405 = vmatmul.mubr.bf16.vlgmr.msra.gmra.mxu1 %v3592_v35 }
  0xc2   : > { %v3593_v36 = vld [vmem:[#allocation3 + $0xb0] ss:$36 sps:$4 sm:$0xff]  }
  0xc3   : > { %3408 = vmatprep.mubr.bf16.mxu1 %v3593_v36 }
  0xc4   : > { %v3594_v37 = vld [vmem:[#allocation3 + $0xf8] ss:$36 sps:$4 sm:$0xff]  }
  0xc9   : > { %3409 = vmatmul.mubr.bf16.gmra.mxu1 %v3594_v37 }
  0xf0   : > { %v3382_v38 = vpop.f32.mrf.mxu0 }
  0xf1   : > { %v560_v39 = vadd.f32 %v3382_v38, %v3011_v6 }
  0xf2   : > { %v551_v40 = vpop.f32.mrf.mxu0 }
  0xf3   : > { %v584_v41 = vpack.c.bf16 %v560_v39, %v560_v39  ;;  %v552_v42 = vadd.f32 %v3011_v6, %v551_v40 }
  0xf4   : > { %v3383_v43 = vpop.f32.mrf.mxu0 }
  0xf5   : > { %593 = vst.msk [vmem:[%s4326_s29 + $0x8] sm:$0xf] %vm590_vm13, %v584_v41  ;;  %v582_v45 = vpack.c.bf16 %v552_v42, %v552_v42  ;;  %v563_v46 = vadd.f32 %v3383_v43, %v3011_v6 }
  0xf6   : > { %v554_v47 = vpop.f32.mrf.mxu0 }
  0xf7   : > { %591 = vst.msk [vmem:[%s4326_s29] sm:$0xf] %vm590_vm13, %v582_v45  ;;  %v585_v48 = vpack.c.bf16 %v563_v46, %v563_v46  ;;  %v555_v49 = vadd.f32 %v3011_v6, %v554_v47 }
  0xf9   : > { %594 = vst.msk [vmem:[%s4326_s29 + $0xc] sm:$0xf] %vm590_vm13, %v585_v48  ;;  %v583_v50 = vpack.c.bf16 %v555_v49, %v555_v49 }
  0xfb   : > { %592 = vst.msk [vmem:[%s4326_s29 + $0x4] sm:$0xf] %vm590_vm13, %v583_v50 }
 0x102   : > { %v3386_v51 = vpop.f32.mrf.mxu0 }
 0x103   : > { %v576_v52 = vadd.f32 %v3386_v51, %v3011_v6 }
 0x104   : > { %v567_v53 = vpop.f32.mrf.mxu0 }
 0x105   : > { %v588_v54 = vpack.c.bf16 %v576_v52, %v576_v52  ;;  %v568_v55 = vadd.f32 %v3011_v6, %v567_v53 }
 0x106   : > { %v3387_v56 = vpop.f32.mrf.mxu0 }
 0x107   : > { %597 = vst.msk [vmem:[%s4326_s29 + $0x18] sm:$0xf] %vm590_vm13, %v588_v54  ;;  %v586_v58 = vpack.c.bf16 %v568_v55, %v568_v55  ;;  %v579_v59 = vadd.f32 %v3387_v56, %v3011_v6 }
 0x108   : > { %v570_v60 = vpop.f32.mrf.mxu0 }
 0x109   : > { %595 = vst.msk [vmem:[%s4326_s29 + $0x10] sm:$0xf] %vm590_vm13, %v586_v58  ;;  %v589_v61 = vpack.c.bf16 %v579_v59, %v579_v59  ;;  %v571_v62 = vadd.f32 %v3011_v6, %v570_v60 }
 0x10b   : > { %598 = vst.msk [vmem:[%s4326_s29 + $0x1c] sm:$0xf] %vm590_vm13, %v589_v61  ;;  %v587_v63 = vpack.c.bf16 %v571_v62, %v571_v62 }
 0x10d   : > { %596 = vst.msk [vmem:[%s4326_s29 + $0x14] sm:$0xf] %vm590_vm13, %v587_v63 }
 0x118   : > { %v4348_v2 = vpop.f32.mrf.mxu0 }
 0x11a   : > { %v4352_v7 = vpop.f32.mrf.mxu0 }
 0x11b   : > { %v4344_v0 = vpop.f32.mrf.mxu1 }
 0x11c   : > { %v4356_v5 = vpop.f32.mrf.mxu0 }
 0x11d   : > { %v4346_v1 = vpop.f32.mrf.mxu1 }
 0x11e   : > { %v4360_v9 = vpop.f32.mrf.mxu0 }
 0x11f   : > { %v4350_v4 = vpop.f32.mrf.mxu1 }
 0x121   : > { %v4354_v3 = vpop.f32.mrf.mxu1 }
 0x124   : > { %v4373_v44 = vpop.f32.mrf.mxu0 }
 0x125   : > { %v4358_v8 = vpop.f32.mrf.mxu1 }
 0x127   : > { %v4362_v11 = vpop.f32.mrf.mxu1 }
 0x129   : > { %v4375_v57 = vpop.f32.mrf.mxu1 }
 0x12a   : > { %3608 = shalt.err (!%p3605_p3)
}
 0x12b   : > { %s3609_s29 = scalar_lea.hbm %s4371_s17, 512  ;;  %s3613_s26 = scalar_lea.hbm %s4642_s10, 1024 }
 0x12c   : > { %p3610_p4 = scmp.ne.s32.totalorder %s4371_s17, %s3609_s29  ;;  %p3614_p9 = scmp.lt.s32.totalorder %s4371_s17, %s4642_s10 }
 0x12d   : > { %p3615_p10 = scmp.lt.s32.totalorder %s3613_s26, %s3609_s29 }
 0x12e   : > { %p3611_p7 = pnand %p3610_p4, %p3855_p5 }
 0x12f   : > { %p3616_p11 = por %p3615_p10, %p3614_p9 }
 0x130   : > { %p3612_p8 = pneg %p3611_p7 }
 0x132   : > { %p3617_p12 = pnand %p3616_p11, %p3612_p8 }
 0x134   : > { %3620 = shalt.err (!%p3617_p12)
}
 0x135   : > { %s4648_s15 = smov 64   ;;  %s4649_s20 = smov 4   ;;  %v3267_v10 = vpop.f32.mrf.mxu0  ;;  %v3230_v12 = vpop.f32.mrf.mxu1  ;;  %v3228_v51 = vadd.f32 %v4362_v11, %v4358_v8  ;;  %v3222_v52 = vadd.f32 %v4346_v1, %v4344_v0  ;;  %v3052_v55 = vld [vmem:[%s4636_s4] ss:$0 sm:$0xff]  ;;  %v3225_v56 = vadd.f32 %v4354_v3, %v4350_v4  ;;  %v3262_v63 = vadd.f32 %v4352_v7, %v4348_v2 }
 0x136   : > { %3413 = dma.vmem_to_hbm [thread:$0]  (%p3855_p5), %s4378_s0, 512, %s4371_s17, %s4380_s19, %s4648_s15, %s4648_s15, %s4649_s20   ;;  %v3268_v59 = vadd.f32 %v3267_v10, %v4373_v44  ;;  %v3231_v60 = vadd.f32 %v3230_v12, %v4375_v57  ;;  %v3265_v11 = vadd.f32 %v4360_v9, %v4356_v5  ;;  %vm2731_vm14 = vcmask 523264  }
 0x137   : > { %v3269_v15 = vpop.f32.mrf.mxu0  ;;  %v3232_v13 = vpop.f32.mrf.mxu1  ;;  %v2401_v58 = vadd.f32 %v3228_v51, %v3052_v55  ;;  %v2393_v62 = vadd.f32 %v3222_v52, %v3052_v55  ;;  %v2396_v8 = vadd.f32 %v3225_v56, %v3052_v55  ;;  %s4677_s28 = sshll.u32 %s4318_s18, 5  ;;  %s4681_s30 = sshll.u32 %s3836_s25, 9 }
 0x138   : > { %v2404_v4 = vadd.f32 %v3231_v60, %v3052_v55  ;;  %s4476_s17 = scalar_lea.vmem [#allocation4], %s4677_s28  ;;  %s4508_s26 = scalar_lea.hbm %s4641_s9, %s4681_s30 }
 0x139   : > { %v3233_v14 = vpop.f32.mrf.mxu1  ;;  %v3270_v16 = vpop.f32.mrf.mxu0  ;;  %v2458_v57 = vadd.f32 %v3262_v63, %v2393_v62  ;;  %v2461_v7 = vadd.f32 %v3265_v11, %v2396_v8  ;;  %s2812_s0 = sshll.u32 %s4476_s17, 4  ;;  %s2786_s1 = scalar_lea.sflag [#allocation5], %s4318_s18  ;;  %s4510_s0 = int_to_ptr.vmem [resolvable:$true] %s2812_s0 }
 0x13a   : > { %v3271_v3 = vadd.f32 %v3270_v16, %v3269_v15  ;;  %v3234_v52 = vadd.f32 %v3233_v14, %v3232_v13  ;;  %s3621_s2 = scalar_lea.vmem %s4510_s0, 512  ;;  %s3747_s28 = smov [#allocation4]  }
 0x13b   : > { %v4406_v17 = vpop.f32.mrf.mxu1  ;;  %v4408_v19 = vpop.f32.mrf.mxu0  ;;  %p3622_p13 = scmp.ne.s32.totalorder %s4510_s0, %s3621_s2  ;;  %s3625_s30 = sshll.u32 %s3747_s28, 4  ;;  %s3626_s30 = int_to_ptr.vmem [resolvable:$false] %s3625_s30 }
 0x13c   : > { %v2469_v56 = vadd.f32 %v3271_v3, %v2404_v4  ;;  %v2409_v14 = vadd.f32 %v3234_v52, %v3052_v55  ;;  %s3627_s29 = scalar_lea.vmem %s3626_s30, 1024  ;;  %p3628_p2 = scmp.lt.s32.totalorder %s4510_s0, %s3626_s30 }
 0x13d   : > { %v4410_v20 = vpop.f32.mrf.mxu1  ;;  %v4412_v21 = vpop.f32.mrf.mxu0  ;;  %p3623_p0 = pnand %p3622_p13, %p3855_p5  ;;  %p3629_p3 = scmp.lt.s32.totalorder %s3627_s29, %s3621_s2 }
 0x13e   : > { %v3274_v15 = vadd.f32 %v4412_v21, %v4408_v19  ;;  %v3237_v16 = vadd.f32 %v4410_v20, %v4406_v17 }
 0x13f   : > { %v3238_v22 = vpop.f32.mrf.mxu1  ;;  %v4414_v23 = vpop.f32.mrf.mxu0  ;;  %p3624_p1 = pneg %p3623_p0  ;;  %p3630_p4 = por %p3629_p3, %p3628_p2 }
 0x141   : > { %v3239_v24 = vpop.f32.mrf.mxu1  ;;  %v4416_v25 = vpop.f32.mrf.mxu0  ;;  %p3631_p7 = pnand %p3630_p4, %p3624_p1 }
 0x142   : > { %v3240_v10 = vadd.f32 %v3239_v24, %v3238_v22 }
 0x143   : > { %v3241_v26 = vpop.f32.mrf.mxu1  ;;  %v4418_v27 = vpop.f32.mrf.mxu0 }
 0x144   : > { %v2417_v22 = vadd.f32 %v3240_v10, %v3052_v55 }
 0x145   : > { %v3242_v28 = vpop.f32.mrf.mxu1  ;;  %v4420_v29 = vpop.f32.mrf.mxu0 }
 0x146   : > { %v3280_v13 = vadd.f32 %v4420_v29, %v4418_v27 }
 0x147   : > { %v4422_v18 = vpop.f32.mrf.mxu0 }
 0x149   : > { %v3300_v30 = vpop.f32.mrf.mxu1  ;;  %v4424_v32 = vpop.f32.mrf.mxu0 }
 0x14b   : > { %v3301_v31 = vpop.f32.mrf.mxu1 }
 0x14c   : > { %v3302_v51 = vadd.f32 %v3301_v31, %v3300_v30  ;;  %v3277_v31 = vadd.f32 %v4416_v25, %v4414_v23  ;;  %v2474_v25 = vadd.f32 %v3274_v15, %v2409_v14 }
 0x14d   : > { %v3303_v33 = vpop.f32.mrf.mxu1 }
 0x14f   : > { %v3304_v36 = vpop.f32.mrf.mxu1 }
 0x150   : > { %v3305_v9 = vadd.f32 %v3304_v36, %v3303_v33  ;;  %v2412_v36 = vadd.f32 %v3237_v16, %v3052_v55 }
 0x153   : > { %v3340_v34 = vpop.f32.mrf.mxu0 }
 0x155   : > { %v3341_v35 = vpop.f32.mrf.mxu0 }
 0x156   : > { %v3342_v5 = vadd.f32 %v3341_v35, %v3340_v34  ;;  %v3283_v34 = vadd.f32 %v4424_v32, %v4422_v18  ;;  %v2526_v35 = vadd.f32 %v3305_v9, %v2461_v7 }
 0x157   : > { %v4426_v37 = vpop.f32.mrf.mxu0 }
 0x159   : > { %v3306_v6 = vpop.f32.mrf.mxu1  ;;  %v4428_v39 = vpop.f32.mrf.mxu0 }
 0x15a   : > { %v3345_v17 = vadd.f32 %v4428_v39, %v4426_v37 }
 0x15b   : > { %v3307_v38 = vpop.f32.mrf.mxu1 }
 0x15c   : > { %v3308_v1 = vadd.f32 %v3307_v38, %v3306_v6  ;;  %v3243_v6 = vadd.f32 %v3242_v28, %v3241_v26 }
 0x15d   : > { %v3309_v40 = vpop.f32.mrf.mxu1 }
 0x15e   : > { %v2420_v33 = vadd.f32 %v3243_v6, %v3052_v55  ;;  %v2477_v55 = vadd.f32 %v3277_v31, %v2412_v36 }
 0x15f   : > { %v3310_v42 = vpop.f32.mrf.mxu1 }
 0x160   : > { %v3311_v2 = vadd.f32 %v3310_v42, %v3309_v40  ;;  %v2482_v40 = vadd.f32 %v3280_v13, %v2417_v22  ;;  %v2485_v32 = vadd.f32 %v3283_v34, %v2420_v33 }
 0x161   : > { %v3346_v41 = vpop.f32.mrf.mxu0 }
 0x162   : > { %v2534_v24 = vadd.f32 %v3311_v2, %v2469_v56 }
 0x163   : > { %v3347_v43 = vpop.f32.mrf.mxu0 }
 0x165   : > { %v3349_v46 = vpop.f32.mrf.mxu0 }
 0x166   : > { %v4430_v45 = vpop.f32.mrf.mxu1 }
 0x167   : > { %v3350_v48 = vpop.f32.mrf.mxu0 }
 0x168   : > { %v3313_v47 = vpop.f32.mrf.mxu1  ;;  %v3351_v30 = vadd.f32 %v3350_v48, %v3349_v46 }
 0x16a   : > { %v4432_v49 = vpop.f32.mrf.mxu1  ;;  %v2599_v18 = vadd.f32 %v3351_v30, %v2534_v24 }
 0x16b   : > { %4670 = vst [vmem:[#allocation15_spill] sm:$0xff] %v4432_v49  ;;  %v2523_v49 = vadd.f32 %v3302_v51, %v2458_v57 }
 0x16c   : > { %v4442_v54 = vpop.f32.mrf.mxu1 }
 0x16d   : > { %4673 = vst [vmem:[#allocation18_spill] sm:$0xff] %v4442_v54  ;;  %v3348_v54 = vadd.f32 %v3347_v43, %v3346_v41  ;;  %v2588_v29 = vadd.f32 %v3342_v5, %v2523_v49  ;;  %v3314_v41 = vadd.f32 %v3313_v47, %v4430_v45  ;;  %v2591_v49 = vadd.f32 %v3345_v17, %v2526_v35 }
 0x16f   : > { %v2539_v60 = vadd.f32 %v3314_v41, %v2474_v25 }
 0x170   : > { %v4434_v50 = vpop.f32.mrf.mxu0 }
 0x171   : > { %4671 = vst [vmem:[#allocation16_spill] sm:$0xff] %v4434_v50  ;;  %v2466_v50 = vadd.f32 %v3268_v59, %v2401_v58 }
 0x172   : > { %v4440_v53 = vpop.f32.mrf.mxu0  ;;  %v4675_v48 = vld [vmem:[#allocation15_spill] sm:$0xff] }
 0x173   : > { %4672 = vst [vmem:[#allocation17_spill] sm:$0xff] %v4440_v53 }
 0x174   : > { %v4451_v61 = vpop.f32.mrf.mxu0 }
 0x175   : > { %4674 = vst [vmem:[#allocation19_spill] sm:$0xff] %v4451_v61  ;;  %v3318_v0 = vpop.f32.mrf.mxu1  ;;  %v2531_v61 = vadd.f32 %v3308_v1, %v2466_v50  ;;  %v4676_v50 = vld [vmem:[#allocation18_spill] sm:$0xff] }
 0x176   : > { %v4457_v44 = vpop.f32.mrf.mxu0 }
 0x177   : > { %v3319_v53 = vpop.f32.mrf.mxu1  ;;  %v2596_v28 = vadd.f32 %v3348_v54, %v2531_v61 }
 0x178   : > { %v3320_v19 = vadd.f32 %v3319_v53, %v3318_v0  ;;  %v3317_v53 = vadd.f32 %v4676_v50, %v4675_v48  ;;  %v4678_v61 = vld [vmem:[#allocation16_spill] sm:$0xff] }
 0x179   : > { %v3321_v12 = vpop.f32.mrf.mxu1 }
 0x17a   : > { %v2547_v54 = vadd.f32 %v3320_v19, %v2482_v40  ;;  %v4679_v62 = vld [vmem:[#allocation17_spill] sm:$0xff]  ;;  %v2542_v51 = vadd.f32 %v3317_v53, %v2477_v55 }
 0x17b   : > { %v3322_v38 = vpop.f32.mrf.mxu1  ;;  %v3354_v63 = vadd.f32 %v4679_v62, %v4678_v61 }
 0x17c   : > { %v3323_v42 = vadd.f32 %v3322_v38, %v3321_v12  ;;  %v4680_v12 = vld [vmem:[#allocation19_spill] sm:$0xff] }
 0x17d   : > { %v3357_v52 = vadd.f32 %v4457_v44, %v4680_v12  ;;  %v2604_v56 = vadd.f32 %v3354_v63, %v2539_v60 }
 0x17e   : > { %v3358_v58 = vpop.f32.mrf.mxu0  ;;  %v2550_v0 = vadd.f32 %v3323_v42, %v2485_v32 }
 0x17f   : > { %v2607_v30 = vadd.f32 %v3357_v52, %v2542_v51 }
 0x180   : > { %v3359_v26 = vpop.f32.mrf.mxu0 }
 0x181   : > { %v3406_v21 = vpop.f32.mrf.mxu1  ;;  %v3360_v37 = vadd.f32 %v3359_v26, %v3358_v58 }
 0x182   : > { %v3361_v20 = vpop.f32.mrf.mxu0  ;;  %v2661_v27 = vadd.f32 %v3406_v21, %v2596_v28 }
 0x183   : > { %v2652_v23 = vpop.f32.mrf.mxu1  ;;  %v2612_v57 = vadd.f32 %v3360_v37, %v2547_v54 }
 0x184   : > { %v3190_v43 = vpack.c.bf16 %v2661_v27, %v2661_v27  ;;  %v2653_v46 = vadd.f32 %v2652_v23, %v2588_v29  ;;  %v3362_v39 = vpop.f32.mrf.mxu0 }
 0x185   : > { %v3407_v59 = vpop.f32.mrf.mxu1  ;;  %v3363_v8 = vadd.f32 %v3362_v39, %v3361_v20 }
 0x186   : > { %2717 = vst.msk [vmem:[%s4476_s17 + $0x8] sm:$0xf] %vm590_vm13, %v3190_v43  ;;  %v3188_v45 = vpack.c.bf16 %v2653_v46, %v2653_v46  ;;  %v2664_v47 = vadd.f32 %v3407_v59, %v2599_v18 }
 0x187   : > { %v2655_v1 = vpop.f32.mrf.mxu1  ;;  %v2615_v9 = vadd.f32 %v3363_v8, %v2550_v0 }
 0x188   : > { %2715 = vst.msk [vmem:[%s4476_s17] sm:$0xf] %vm590_vm13, %v3188_v45  ;;  %v2684_v11 = vpack.c.bf16 %v2664_v47, %v2661_v27  ;;  %v3191_v4 = vpack.c.bf16 %v2664_v47, %v2664_v47  ;;  %v2656_v3 = vadd.f32 %v2655_v1, %v2591_v49 }
 0x189   : > { %v3410_v10 = vpop.f32.mrf.mxu1 }
 0x18a   : > { %2718 = vst.msk [vmem:[%s4476_s17 + $0xc] sm:$0xf] %vm590_vm13, %v3191_v4  ;;  %v2725_v2 = vunpack.c.l.bf16 %v2684_v11  ;;  %v2683_v7 = vpack.c.bf16 %v2656_v3, %v2653_v46  ;;  %v3189_v6 = vpack.c.bf16 %v2656_v3, %v2656_v3  ;;  %v2677_v38 = vadd.f32 %v3410_v10, %v2612_v57 }
 0x18b   : > { %v2668_v5 = vpop.f32.mrf.mxu1  ;;  %v2726_v44 = vunpack.c.h.bf16 %v2684_v11 }
 0x18c   : > { %2716 = vst.msk [vmem:[%s4476_s17 + $0x4] sm:$0xf] %vm590_vm13, %v3189_v6  ;;  %v2723_v58 = vunpack.c.l.bf16 %v2683_v7  ;;  %v2724_v15 = vunpack.c.h.bf16 %v2683_v7  ;;  %v3194_v16 = vpack.c.bf16 %v2677_v38, %v2677_v38  ;;  %v2669_v22 = vadd.f32 %v2668_v5, %v2604_v56 }
 0x18d   : > { %v3411_v13 = vpop.f32.mrf.mxu1  ;;  %v2757_v14 = vmul.f32 %v2725_v2, %v2725_v2  ;;  %v2735_v19 = vsel %vm2731_vm14, %v2725_v2, 0.0  ;;  %v2758_v42 = vmul.f32 %v2726_v44, %v2726_v44  ;;  %v2737_v18 = vsel %vm2731_vm14, %v2726_v44, 0.0 }
 0x18e   : > { %v2680_v24 = vadd.f32 %v3411_v13, %v2615_v9  ;;  %v2732_v26 = vsel %vm2731_vm14, %v2723_v58, 0.0  ;;  %v2733_v28 = vsel %vm2731_vm14, %v2724_v15, 0.0  ;;  %v2755_v31 = vmul.f32 %v2723_v58, %v2723_v58  ;;  %2721 = vst.msk [vmem:[%s4476_s17 + $0x18] sm:$0xf] %vm590_vm13, %v3194_v16 }
 0x18f   : > { %v2756_v33 = vmul.f32 %v2724_v15, %v2724_v15  ;;  %v2671_v34 = vpop.f32.mrf.mxu1  ;;  %v2734_v21 = vadd.f32 %v2733_v28, %v2732_v26  ;;  %v3192_v35 = vpack.c.bf16 %v2669_v22, %v2669_v22  ;;  %v2766_v23 = vsel %vm2731_vm14, %v2757_v14, 0.0 }
 0x190   : > { %v3195_v17 = vpack.c.bf16 %v2680_v24, %v2680_v24  ;;  %v2763_v20 = vsel %vm2731_vm14, %v2755_v31, 0.0  ;;  %v2686_v29 = vpack.c.bf16 %v2680_v24, %v2677_v38  ;;  %v2672_v36 = vadd.f32 %v2671_v34, %v2607_v30 }
 0x191   : > { %v2764_v27 = vsel %vm2731_vm14, %v2756_v33, 0.0  ;;  %v2736_v40 = vadd.f32 %v2735_v19, %v2734_v21  ;;  %2719 = vst.msk [vmem:[%s4476_s17 + $0x10] sm:$0xf] %vm590_vm13, %v3192_v35 }
 0x192   : > { %v2765_v41 = vadd.f32 %v2764_v27, %v2763_v20  ;;  %2722 = vst.msk [vmem:[%s4476_s17 + $0x1c] sm:$0xf] %vm590_vm13, %v3195_v17  ;;  %v2685_v25 = vpack.c.bf16 %v2672_v36, %v2669_v22  ;;  %v3193_v43 = vpack.c.bf16 %v2672_v36, %v2672_v36  ;;  %v2729_v32 = vunpack.c.l.bf16 %v2686_v29 }
 0x193   : > { %v2738_v53 = vadd.f32 %v2737_v18, %v2736_v40 }
 0x194   : > { %v2767_v46 = vadd.f32 %v2766_v23, %v2765_v41  ;;  %2720 = vst.msk [vmem:[%s4476_s17 + $0x14] sm:$0xf] %vm590_vm13, %v3193_v43  ;;  %v2727_v48 = vunpack.c.l.bf16 %v2685_v25  ;;  %v2728_v50 = vunpack.c.h.bf16 %v2685_v25 }
 0x195   : > { %3634 = shalt.err (!%p3631_p7)
}
 0x196   : > { %s3635_s17 = scalar_lea.hbm %s4508_s26, 512  ;;  %s3639_s28 = scalar_lea.hbm %s4641_s9, 1024 }
 0x197   : > { %p3636_p8 = scmp.ne.s32.totalorder %s4508_s26, %s3635_s17  ;;  %p3640_p11 = scmp.lt.s32.totalorder %s4508_s26, %s4641_s9 }
 0x198   : > { %p3641_p12 = scmp.lt.s32.totalorder %s3639_s28, %s3635_s17 }
 0x199   : > { %p3637_p9 = pnand %p3636_p8, %p3855_p5 }
 0x19a   : > { %p3642_p13 = por %p3641_p12, %p3640_p11 }
 0x19b   : > { %p3638_p10 = pneg %p3637_p9 }
 0x19d   : > { %p3643_p0 = pnand %p3642_p13, %p3638_p10 }
 0x19f   : > { %3646 = shalt.err (!%p3643_p0)
}
 0x1a0   : > { %s4682_s2 = smov 4   ;;  %s4683_s30 = smov 64   ;;  %v2768_v54 = vsel %vm2731_vm14, %v2758_v42, 0.0  ;;  %v2730_v37 = vunpack.c.h.bf16 %v2686_v29  ;;  %v2739_v39 = vsel %vm2731_vm14, %v2727_v48, 0.0  ;;  %v2759_v59 = vmul.f32 %v2727_v48, %v2727_v48 }
 0x1a1   : > { %3412 = dma.vmem_to_hbm [thread:$0]  (%p3855_p5), %s4510_s0, 512, %s4508_s26, %s2786_s1, %s4683_s30, %s4683_s30, %s4682_s2   ;;  %v2740_v45 = vadd.f32 %v2739_v39, %v2738_v53  ;;  %v2760_v47 = vmul.f32 %v2728_v50, %v2728_v50  ;;  %v2769_v49 = vadd.f32 %v2768_v54, %v2767_v46  ;;  %v2761_v55 = vmul.f32 %v2729_v32, %v2729_v32 }
 0x1a2   : > { %v2741_v60 = vsel %vm2731_vm14, %v2728_v50, 0.0  ;;  %v2770_v61 = vsel %vm2731_vm14, %v2759_v59, 0.0  ;;  %v2743_v0 = vsel %vm2731_vm14, %v2729_v32, 0.0  ;;  %v2762_v1 = vmul.f32 %v2730_v37, %v2730_v37  ;;  %s3175_s3 = sshll.u32 %s3836_s25, 4  ;;  %s426_s15 = scalar_lea.vmem [#allocation8], %s4318_s18 }
 0x1a3   : > { %v2742_v62 = vadd.f32 %v2741_v60, %v2740_v45  ;;  %v2771_v63 = vadd.f32 %v2770_v61, %v2769_v49  ;;  %v2772_v8 = vsel %vm2731_vm14, %v2760_v47, 0.0  ;;  %v2745_v3 = vsel %vm2731_vm14, %v2730_v37, 0.0  ;;  %s2844_s20 = sshll.u32 %s426_s15, 4  ;;  %s4650_s0 = scalar_lea.vmem [#allocation9], %s4318_s18  ;;  %s4558_s20 = int_to_ptr.vmem [resolvable:$true] %s2844_s20 }
 0x1a4   : > { %v2774_v51 = vsel %vm2731_vm14, %v2761_v55, 0.0  ;;  %v2776_v12 = vsel %vm2731_vm14, %v2762_v1, 0.0  ;;  %vm2753_vm15 = vcmask 516096   ;;  %s2857_s26 = sshll.u32 %s4650_s0, 4  ;;  %s4556_s17 = scalar_lea.hbm %s4643_s11, %s3175_s3  ;;  %s4566_s26 = int_to_ptr.vmem [resolvable:$true] %s2857_s26 }
 0x1a5   : > { %v2744_v11 = vadd.f32 %v2743_v0, %v2742_v62  ;;  %v2773_v4 = vadd.f32 %v2772_v8, %v2771_v63  ;;  %s4564_s28 = scalar_lea.hbm %s4644_s12, %s3175_s3  ;;  %s3647_s2 = scalar_lea.vmem %s4558_s20, 16 }
 0x1a6   : > { %p3648_p1 = scmp.ne.s32.totalorder %s4558_s20, %s3647_s2  ;;  %s3748_s30 = smov [#allocation8]  }
 0x1a7   : > { %v2746_v57 = vadd.f32 %v2745_v3, %v2744_v11  ;;  %v2775_v10 = vadd.f32 %v2774_v51, %v2773_v4  ;;  %s3651_s1 = sshll.u32 %s3748_s30, 4  ;;  %s3652_s1 = int_to_ptr.vmem [resolvable:$false] %s3651_s1 }
 0x1a8   : > { %p3649_p2 = pnand %p3648_p1, %p3855_p5  ;;  %s3653_s29 = scalar_lea.vmem %s3652_s1, 32 }
 0x1a9   : > { %v2747_v52 = vrot.slane %v2746_v57, 4  ;;  %v2777_v2 = vadd.f32 %v2776_v12, %v2775_v10  ;;  %p3654_p4 = scmp.lt.s32.totalorder %s4558_s20, %s3652_s1  ;;  %p3655_p7 = scmp.lt.s32.totalorder %s3653_s29, %s3647_s2 }
 0x1aa   : > { %p3650_p3 = pneg %p3649_p2 }
 0x1ab   : > { %v2748_v7 = vadd.f32 %v2747_v52, %v2746_v57  ;;  %v2778_v6 = vrot.slane %v2777_v2, 4  ;;  %p3656_p8 = por %p3655_p7, %p3654_p4 }
 0x1ad   : > { %v2749_v38 = vrot.slane %v2748_v7, 2  ;;  %v2779_v56 = vadd.f32 %v2778_v6, %v2777_v2  ;;  %p3657_p9 = pnand %p3656_p8, %p3650_p3 }
 0x1af   : > { %v2750_v5 = vadd.f32 %v2749_v38, %v2748_v7  ;;  %v2780_v9 = vrot.slane %v2779_v56, 2 }
 0x1b1   : > { %v2751_v58 = vrot.slane %v2750_v5, 1  ;;  %v2781_v15 = vadd.f32 %v2780_v9, %v2779_v56 }
 0x1b3   : > { %v2752_v16 = vadd.f32 %v2751_v58, %v2750_v5  ;;  %v2782_v22 = vrot.slane %v2781_v15, 1 }
 0x1b5   : > { %2754 = vst.msk [vmem:[%s426_s15] sm:$0x1] %vm2753_vm15, %v2752_v16  ;;  %v2783_v13 = vadd.f32 %v2782_v22, %v2781_v15 }
 0x1b6   : > { %3660 = shalt.err (!%p3657_p9)
}
 0x1b7   : > { %s3661_s3 = scalar_lea.hbm %s4556_s17, 16  ;;  %s3665_s16 = scalar_lea.hbm %s4643_s11, 32 }
 0x1b8   : > { %p3662_p10 = scmp.ne.s32.totalorder %s4556_s17, %s3661_s3  ;;  %p3666_p13 = scmp.lt.s32.totalorder %s4556_s17, %s4643_s11 }
 0x1b9   : > { %p3667_p0 = scmp.lt.s32.totalorder %s3665_s16, %s3661_s3 }
 0x1ba   : > { %p3663_p11 = pnand %p3662_p10, %p3855_p5 }
 0x1bb   : > { %p3668_p1 = por %p3667_p0, %p3666_p13 }
 0x1bc   : > { %p3664_p12 = pneg %p3663_p11 }
 0x1be   : > { %p3669_p2 = pnand %p3668_p1, %p3664_p12 }
 0x1c0   : > { %3672 = shalt.err (!%p3669_p2)
}
 0x1c1   : > { %3414 = dma.vmem_to_hbm [thread:$0]  (%p3855_p5), %s4558_s20, 16, %s4556_s17, %s4380_s19  }
 0x1c2   : > { %s4684_s2 = scalar_lea.vmem [#allocation9], %s4318_s18  ;;  %s2800_s0 = scalar_lea.sflag [#allocation10], %s4318_s18 }
 0x1c3   : > { %2784 = vst.msk [vmem:[%s4684_s2] sm:$0x1] %vm2753_vm15, %v2783_v13  ;;  %s3673_s1 = scalar_lea.vmem %s4566_s26, 16  ;;  %s3749_s29 = smov [#allocation9]  }
 0x1c4   : > { %p3674_p3 = scmp.ne.s32.totalorder %s4566_s26, %s3673_s1  ;;  %s3677_s3 = sshll.u32 %s3749_s29, 4  ;;  %s3678_s3 = int_to_ptr.vmem [resolvable:$false] %s3677_s3 }
 0x1c5   : > { %s3679_s15 = scalar_lea.vmem %s3678_s3, 32  ;;  %p3680_p8 = scmp.lt.s32.totalorder %s4566_s26, %s3678_s3 }
 0x1c6   : > { %p3675_p4 = pnand %p3674_p3, %p3855_p5  ;;  %p3681_p9 = scmp.lt.s32.totalorder %s3679_s15, %s3673_s1 }
 0x1c8   : > { %p3676_p7 = pneg %p3675_p4  ;;  %p3682_p10 = por %p3681_p9, %p3680_p8 }
 0x1ca   : > { %p3683_p11 = pnand %p3682_p10, %p3676_p7 }
 0x1cc   : > { %3686 = shalt.err (!%p3683_p11)
}
 0x1cd   : > { %s3687_s19 = scalar_lea.hbm %s4564_s28, 16  ;;  %s3691_s17 = scalar_lea.hbm %s4644_s12, 32 }
 0x1ce   : > { %p3688_p12 = scmp.ne.s32.totalorder %s4564_s28, %s3687_s19  ;;  %p3692_p1 = scmp.lt.s32.totalorder %s4564_s28, %s4644_s12 }
 0x1cf   : > { %p3693_p2 = scmp.lt.s32.totalorder %s3691_s17, %s3687_s19 }
 0x1d0   : > { %p3689_p13 = pnand %p3688_p12, %p3855_p5 }
 0x1d1   : > { %p3694_p3 = por %p3693_p2, %p3692_p1 }
 0x1d2   : > { %p3690_p0 = pneg %p3689_p13 }
 0x1d4   : > { %p3695_p4 = pnand %p3694_p3, %p3690_p0 }
 0x1d6   : > { %3698 = shalt.err (!%p3695_p4)
}
 0x1d7   : > { %3415 = dma.vmem_to_hbm [thread:$0]  (%p3855_p5), %s4566_s26, 16, %s4564_s28, %s2800_s0  }
 0x1d8 PF: > { %p3433_p7 = scmp.ge.s32.totalorder %s3741_s24, 2  ;;  %s2869_s30 = sand.u32 1, %s3729_s21  }
 0x1d9   : > { %s2870_s2 = scalar_lea.sflag [#allocation5], %s2869_s30 }
 0x1da   : > { %p3421_p8 = pnand %p3433_p7, %p3859_p6 }
 0x1dc   : > { %p3422_p9 = pneg %p3421_p8 }
 0x1de   : > { %3716 = dma.done.wait (%p3422_p9), %s2870_s2, 512  }
 0x1df   : > { %3718 = vsyncadd (%p3422_p9), %s2870_s2, 4294966784  ;;  %s4685_s1 = sadd.s32 4294967294, %s3741_s24  }
 0x1e0   : > { %s2878_s29 = sand.u32 1, %s4685_s1  }
 0x1e1   : > { %s2879_s3 = scalar_lea.sflag [#allocation7], %s2878_s29 }
 0x1e2   : > { %3720 = dma.done.wait (%p3422_p9), %s2879_s3, 528  }
 0x1e3   : > { %3722 = vsyncadd (%p3422_p9), %s2879_s3, 4294966768  ;;  %s2896_s13 = scalar_lea.sflag [#allocation10], %s2869_s30 }
 0x1e4   : > { %3724 = dma.done.wait (%p3422_p9), %s2896_s13, 16  }
 0x1e5   : > { %3726 = vsyncadd (%p3422_p9), %s2896_s13, 4294967280  ;;  %s4686_s26 = sld [smem:[#allocation14_spill]]  ;;  %p29_p5 = scmp.ge.s32.totalorder %s3840_s27, 4  }
 0x1e6   : > { %s4687_s21 = smov %s3733_s22  ;;  %s4688_s22 = smov %s3737_s23 }
 0x1e7   : > { %s4690_s24 = smov %s3840_s27  ;;  %31 = sbr.rel (!%p29_p5) target bundleno = 12 (0xc), region = 142 }
 0x1eb   : > { %s4689_s23 = smov %s4686_s26 }
 0x1ec   :  { %2900 = vsyncpa [#allocation5], 1 }
 0x1ed   :  { %2902 = vsyncpa [#allocation5 + $0x1], 1 }
 0x1ee   :  { %2903 = vsyncpa [#allocation7], 1 }
 0x1ef   :  { %2905 = vsyncpa [#allocation7 + $0x1], 1 }
 0x1f0   :  { %2906 = vsyncpa [#allocation10], 1 }
 0x1f1   :  { %2908 = vsyncpa [#allocation10 + $0x1], 1 }

</bundles_post_ra>
